<compile_context>
chip_gen: v6e
topology: v6e:2x2x1
jax: 0.10.0
libtpu: 0.0.40
codegen_flags: <defaults>
</compile_context>

<pallas_src>
import functools

import jax
import jax.numpy as jnp
from jax.experimental import pallas as pl
from jax.experimental.pallas import tpu as pltpu

BN_EPS = 1e-5
_VMEM_LIMIT = 48 * 1024 * 1024  # above default scoped VMEM, below v7x physical
_LANE = 128
_TM_TARGET = 512  # 512-row tiles reach ~85% of HBM roofline per measured data


# ---------------------------------------------------------------------------
# helpers
# ---------------------------------------------------------------------------
def _round_up(x, m):
    return ((x + m - 1) // m) * m


def _pick_m_tile(m, target=_TM_TARGET):
    """Largest divisor of m that is <= target and a multiple of 8 (sublane)."""
    if m <= target:
        return m  # full extent is always a legal block dim
    for t in range(target, 7, -1):
        if t % 8 == 0 and m % t == 0:
            return t
    return m  # fallback: single tile


def _pick_c_tile(cpad):
    return 256 if cpad % 256 == 0 else 128  # feed full 256-wide MXU on v6e/v7x


def _pad_last(a, target, value=0.0):
    pad = target - a.shape[-1]
    if pad == 0:
        return a
    widths = [(0, 0)] * (a.ndim - 1) + [(0, pad)]
    return jnp.pad(a, widths, constant_values=value)


# ---------------------------------------------------------------------------
# Pallas kernels
# ---------------------------------------------------------------------------
def _matmul_stats_kernel(x_ref, w_ref, o_ref, sum_ref, sq_ref):
    """Pass 1: bf16 matmul (f32 accumulate) + per-channel sum / sum-of-squares.

    Grid = (c_tiles, m_tiles); axis 1 (M) is the stats-accumulation axis.
    """
    acc = jnp.dot(x_ref[...], w_ref[...], preferred_element_type=jnp.float32)
    o_ref[...] = acc

    @pl.when(pl.program_id(1) == 0)
    def _():
        sum_ref[...] = jnp.zeros_like(sum_ref)
        sq_ref[...] = jnp.zeros_like(sq_ref)

    sum_ref[...] += jnp.sum(acc, axis=0, keepdims=True)
    sq_ref[...] += jnp.sum(acc * acc, axis=0, keepdims=True)


def _affine_kernel(y_ref, s_ref, b_ref, o_ref, *, relu):
    """Pass 2: y * scale + shift (+ optional ReLU)."""
    y = y_ref[...] * s_ref[...] + b_ref[...]
    if relu:
        y = jnp.maximum(y, 0.0)
    o_ref[...] = y.astype(o_ref.dtype)


def _affine_res_relu_kernel(y_ref, s_ref, b_ref, r_ref, rs_ref, rb_ref, o_ref):
    """Pass 2 of conv2 fused with the shortcut's BN-affine, residual add, ReLU."""
    y = y_ref[...] * s_ref[...] + b_ref[...]
    r = r_ref[...].astype(jnp.float32) * rs_ref[...] + rb_ref[...]
    o_ref[...] = jnp.maximum(y + r, 0.0).astype(o_ref.dtype)


# ---------------------------------------------------------------------------
# pallas_call wrappers
# ---------------------------------------------------------------------------
def matmul_with_stats(x2d_bf16, w_bf16):
    """Tiled conv-as-matmul that also returns per-channel sum and sumsq."""
    m, k = x2d_bf16.shape
    cpad = w_bf16.shape[1]
    tm = _pick_m_tile(m)
    tc = _pick_c_tile(cpad)
    grid = (cpad // tc, m // tm)

    out_shape = (
        jax.ShapeDtypeStruct((m, cpad), jnp.float32),  # raw conv output
        jax.ShapeDtypeStruct((1, cpad), jnp.float32),  # per-channel sum
        jax.ShapeDtypeStruct((1, cpad), jnp.float32),  # per-channel sum of squares
    )
    return pl.pallas_call(
        _matmul_stats_kernel,
        out_shape=out_shape,
        grid=grid,
        in_specs=[
            pl.BlockSpec((tm, k), lambda c, i: (i, 0)),
            pl.BlockSpec((k, tc), lambda c, i: (0, c)),
        ],
        out_specs=(
            pl.BlockSpec((tm, tc), lambda c, i: (i, c)),
            pl.BlockSpec((1, tc), lambda c, i: (0, c)),
            pl.BlockSpec((1, tc), lambda c, i: (0, c)),
        ),
        compiler_params=pltpu.CompilerParams(
            dimension_semantics=("parallel", "arbitrary"),
            vmem_limit_bytes=_VMEM_LIMIT,
        ),
    )(x2d_bf16, w_bf16)


def affine_act(y, scale, shift, *, relu, out_dtype):
    m, cpad = y.shape
    tm = _pick_m_tile(m)
    tc = _pick_c_tile(cpad)
    grid = (cpad // tc, m // tm)
    kern = functools.partial(_affine_kernel, relu=relu)
    return pl.pallas_call(
        kern,
        out_shape=jax.ShapeDtypeStruct((m, cpad), out_dtype),
        grid=grid,
        in_specs=[
            pl.BlockSpec((tm, tc), lambda c, i: (i, c)),
            pl.BlockSpec((1, tc), lambda c, i: (0, c)),
            pl.BlockSpec((1, tc), lambda c, i: (0, c)),
        ],
        out_specs=pl.BlockSpec((tm, tc), lambda c, i: (i, c)),
        compiler_params=pltpu.CompilerParams(
            dimension_semantics=("parallel", "parallel"),
            vmem_limit_bytes=_VMEM_LIMIT,
        ),
    )(y, scale, shift)


def affine_residual_relu(y, scale, shift, res, rscale, rshift):
    m, cpad = y.shape
    tm = _pick_m_tile(m)
    tc = _pick_c_tile(cpad)
    grid = (cpad // tc, m // tm)
    return pl.pallas_call(
        _affine_res_relu_kernel,
        out_shape=jax.ShapeDtypeStruct((m, cpad), jnp.float32),
        grid=grid,
        in_specs=[
            pl.BlockSpec((tm, tc), lambda c, i: (i, c)),
            pl.BlockSpec((1, tc), lambda c, i: (0, c)),
            pl.BlockSpec((1, tc), lambda c, i: (0, c)),
            pl.BlockSpec((tm, tc), lambda c, i: (i, c)),
            pl.BlockSpec((1, tc), lambda c, i: (0, c)),
            pl.BlockSpec((1, tc), lambda c, i: (0, c)),
        ],
        out_specs=pl.BlockSpec((tm, tc), lambda c, i: (i, c)),
        compiler_params=pltpu.CompilerParams(
            dimension_semantics=("parallel", "parallel"),
            vmem_limit_bytes=_VMEM_LIMIT,
        ),
    )(y, scale, shift, res, rscale, rshift)


# ---------------------------------------------------------------------------
# BN finalize (tiny (1, C) math, plain JAX) — folds mean/var/gamma/beta into a
# single fused scale/shift so pass 2 is one fma (+max) per element.
# ---------------------------------------------------------------------------
def bn_fold(sum_c, sq_c, gamma, beta, m_rows):
    m_rows = jnp.float32(m_rows)
    mean = sum_c / m_rows
    var = jnp.maximum(sq_c / m_rows - mean * mean, 0.0)  # biased var (PyTorch BN)
    rstd = jax.lax.rsqrt(var + BN_EPS)
    scale = gamma * rstd
    shift = beta - mean * scale
    return scale, shift


# ---------------------------------------------------------------------------
# Glue: im2col patch extraction (pure slicing / reshape) in plain JAX
# ---------------------------------------------------------------------------
def im2col(x_nhwc, ksize, stride, pad):
    n, h, w, c = x_nhwc.shape
    xp = jnp.pad(x_nhwc, ((0, 0), (pad, pad), (pad, pad), (0, 0)))
    ho = (h + 2 * pad - ksize) // stride + 1
    wo = (w + 2 * pad - ksize) // stride + 1
    cols = []
    for kh in range(ksize):
        for kw in range(ksize):
            cols.append(
                xp[:, kh:kh + stride * ho:stride, kw:kw + stride * wo:stride, :]
            )
    patches = jnp.concatenate(cols, axis=-1)  # (N, Ho, Wo, ksize*ksize*C)
    return patches.reshape(n * ho * wo, ksize * ksize * c), (n, ho, wo)


# ---------------------------------------------------------------------------
# BasicBlock parameters & forward
# ---------------------------------------------------------------------------
def init_basic_block_params(key, in_planes, planes, stride):
    ks = jax.random.split(key, 3)
    scale = 0.1
    params = {
        # stored in (kh*kw*Cin, Cout) matmul layout (kh-major, kw, Cin)
        "w1": scale * jax.random.normal(ks[0], (3 * 3 * in_planes, planes), jnp.float32),
        "g1": jnp.ones((1, planes), jnp.float32),
        "b1": jnp.zeros((1, planes), jnp.float32),
        "w2": scale * jax.random.normal(ks[1], (3 * 3 * planes, planes), jnp.float32),
        "g2": jnp.ones((1, planes), jnp.float32),
        "b2": jnp.zeros((1, planes), jnp.float32),
    }
    if stride != 1 or in_planes != planes:
        params["wsc"] = scale * jax.random.normal(ks[2], (in_planes, planes), jnp.float32)
        params["gsc"] = jnp.ones((1, planes), jnp.float32)
        params["bsc"] = jnp.zeros((1, planes), jnp.float32)
    return params


def basic_block_forward(x_nchw, params, in_planes, planes, stride):
    # NCHW -> NHWC
    x = jnp.transpose(x_nchw, (0, 2, 3, 1)).astype(jnp.float32)
    n, h, w, cin = x.shape
    assert cin == in_planes
    cpad = _round_up(planes, _LANE)

    # ---- conv1 (3x3, stride, pad=1) + bn1 + relu ------------------------------
    p1, (nb, ho, wo) = im2col(x, 3, stride, 1)
    m = nb * ho * wo
    w1p = _pad_last(params["w1"], cpad).astype(jnp.bfloat16)
    y1, s1, q1 = matmul_with_stats(p1.astype(jnp.bfloat16), w1p)
    g1 = _pad_last(params["g1"], cpad, 1.0)
    b1 = _pad_last(params["b1"], cpad, 0.0)
    sc1, sh1 = bn_fold(s1, q1, g1, b1, m)
    out1 = affine_act(y1, sc1, sh1, relu=True, out_dtype=jnp.bfloat16)  # (M, Cpad)
    out1_nhwc = out1.reshape(nb, ho, wo, cpad)[..., :planes]  # drop lane padding

    # ---- shortcut branch ------------------------------------------------------
    if stride != 1 or in_planes != planes:
        xs = x[:, ::stride, ::stride, :].reshape(m, in_planes)
        wscp = _pad_last(params["wsc"], cpad).astype(jnp.bfloat16)
        ysc, ssc, qsc = matmul_with_stats(xs.astype(jnp.bfloat16), wscp)
        gsc = _pad_last(params["gsc"], cpad, 1.0)
        bsc = _pad_last(params["bsc"], cpad, 0.0)
        rscale, rshift = bn_fold(ssc, qsc, gsc, bsc, m)
        res = ysc  # raw shortcut conv output; its BN affine fuses into pass 2
    else:
        res = _pad_last(x.reshape(m, in_planes), cpad, 0.0)
        rscale = jnp.ones((1, cpad), jnp.float32)
        rshift = jnp.zeros((1, cpad), jnp.float32)

    # ---- conv2 (3x3, stride=1, pad=1) + bn2 + residual + relu ----------------
    p2, _ = im2col(out1_nhwc, 3, 1, 1)
    w2p = _pad_last(params["w2"], cpad).astype(jnp.bfloat16)
    y2, s2, q2 = matmul_with_stats(p2.astype(jnp.bfloat16), w2p)
    g2 = _pad_last(params["g2"], cpad, 1.0)
    b2 = _pad_last(params["b2"], cpad, 0.0)
    sc2, sh2 = bn_fold(s2, q2, g2, b2, m)
    out = affine_residual_relu(y2, sc2, sh2, res, rscale, rshift)  # (M, Cpad) f32

    # NHWC -> NCHW (drop lane padding)
    out_nhwc = out.reshape(nb, ho, wo, cpad)[..., :planes]
    return jnp.transpose(out_nhwc, (0, 3, 1, 2))


if __name__ == "__main__":
    # Small deterministic example: batch=2, in_planes=4, planes=8, stride=2, 16x16
    key = jax.random.PRNGKey(0)
    k_x, k_p = jax.random.split(key)

    batch, in_planes, planes, stride, hw = 2, 4, 8, 2, 16
    x = jax.random.normal(k_x, (batch, in_planes, hw, hw), jnp.float32)  # NCHW
    params = init_basic_block_params(k_p, in_planes, planes, stride)

    fwd = jax.jit(
        functools.partial(
            basic_block_forward, in_planes=in_planes, planes=planes, stride=stride
        )
    )
    out = jax.block_until_ready(fwd(x, params))

    expected_shape = (batch, planes, hw // stride, hw // stride)
    assert out.shape == expected_shape, (out.shape, expected_shape)
    assert bool(jnp.all(jnp.isfinite(out)))
    assert bool(jnp.all(out >= 0.0))  # final ReLU

    print("KERNEL_OK")
</pallas_src>

<mosaic_0001>
module attributes {stable_mosaic.version = 11 : i64} {
  func.func @_matmul_stats_kernel(%arg0: i32, %arg1: i32, %arg2: memref<128x4xbf16, #tpu.memory_space<vmem>>, %arg3: memref<4x128xbf16, #tpu.memory_space<vmem>>, %arg4: memref<128x128xf32, #tpu.memory_space<vmem>>, %arg5: memref<1x128xf32, #tpu.memory_space<vmem>>, %arg6: memref<1x128xf32, #tpu.memory_space<vmem>>) attributes {dimension_semantics = [#tpu.dimension_semantics<parallel>, #tpu.dimension_semantics<arbitrary>], iteration_bounds = array<i64: 1, 1>, scalar_prefetch = 0 : i64, scratch_operands = 0 : i64, tpu.core_type = #tpu.core_type<tc>, window_params = [{transform_indices = @transform_0, window_bounds = array<i64: 128, 4>}, {transform_indices = @transform_1, window_bounds = array<i64: 4, 128>}, {transform_indices = @transform_2, window_bounds = array<i64: 128, 128>}, {transform_indices = @transform_3, window_bounds = array<i64: 1, 128>}, {transform_indices = @transform_4, window_bounds = array<i64: 1, 128>}]} {
    %c0 = arith.constant 0 : index
    %c0_0 = arith.constant 0 : index
    %0 = vector.load %arg2[%c0, %c0_0] : memref<128x4xbf16, #tpu.memory_space<vmem>>, vector<128x4xbf16>
    %c0_1 = arith.constant 0 : index
    %c0_2 = arith.constant 0 : index
    %1 = vector.load %arg3[%c0_1, %c0_2] : memref<4x128xbf16, #tpu.memory_space<vmem>>, vector<4x128xbf16>
    %cst = arith.constant dense<0.000000e+00> : vector<128x128xf32>
    %2 = tpu.matmul %0, %1, %cst {dimension_numbers = #tpu.dot_dimension_numbers<[1], [0], [0], [1], [0, 0, 1, 1], [], []>} : vector<128x4xbf16>, vector<4x128xbf16>, vector<128x128xf32> -> vector<128x128xf32>
    %c0_3 = arith.constant 0 : index
    %c0_4 = arith.constant 0 : index
    %3 = vector.load %arg4[%c0_3, %c0_4] : memref<128x128xf32, #tpu.memory_space<vmem>>, vector<128x128xf32>
    tpu.vector_store %arg4[%c0_3, %c0_4], %2 {strides = array<i32>} : memref<128x128xf32, #tpu.memory_space<vmem>>, vector<128x128xf32>,
    %c0_i32 = arith.constant 0 : i32
    %4 = arith.cmpi eq, %arg1, %c0_i32 : i32
    %5 = arith.extui %4 : i1 to i32
    %c0_i32_5 = arith.constant 0 : i32
    %6 = arith.cmpi ne, %5, %c0_i32_5 : i32
    scf.if %6 {
      %cst_16 = arith.constant 0.000000e+00 : f32
      %18 = vector.broadcast %cst_16 : f32 to vector<1x128xf32>
      %c0_17 = arith.constant 0 : index
      %c0_18 = arith.constant 0 : index
      %19 = vector.load %arg5[%c0_17, %c0_18] : memref<1x128xf32, #tpu.memory_space<vmem>>, vector<1x128xf32>
      tpu.vector_store %arg5[%c0_17, %c0_18], %18 {strides = array<i32>} : memref<1x128xf32, #tpu.memory_space<vmem>>, vector<1x128xf32>,
      %cst_19 = arith.constant 0.000000e+00 : f32
      %20 = vector.broadcast %cst_19 : f32 to vector<1x128xf32>
      %c0_20 = arith.constant 0 : index
      %c0_21 = arith.constant 0 : index
      %21 = vector.load %arg6[%c0_20, %c0_21] : memref<1x128xf32, #tpu.memory_space<vmem>>, vector<1x128xf32>
      tpu.vector_store %arg6[%c0_20, %c0_21], %20 {strides = array<i32>} : memref<1x128xf32, #tpu.memory_space<vmem>>, vector<1x128xf32>,
    } else {
    }
    %c0_6 = arith.constant 0 : index
    %c0_7 = arith.constant 0 : index
    %7 = vector.load %arg5[%c0_6, %c0_7] : memref<1x128xf32, #tpu.memory_space<vmem>>, vector<1x128xf32>
    %cst_8 = arith.constant dense<0.000000e+00> : vector<128xf32>
    %8 = vector.multi_reduction <add>, %2, %cst_8 [0] : vector<128x128xf32> to vector<128xf32>
    %9 = vector.shape_cast %8 : vector<128xf32> to vector<1x128xf32>
    %10 = arith.addf %7, %9 : vector<1x128xf32>
    %c0_9 = arith.constant 0 : index
    %c0_10 = arith.constant 0 : index
    %11 = vector.load %arg5[%c0_9, %c0_10] : memref<1x128xf32, #tpu.memory_space<vmem>>, vector<1x128xf32>
    tpu.vector_store %arg5[%c0_9, %c0_10], %10 {strides = array<i32>} : memref<1x128xf32, #tpu.memory_space<vmem>>, vector<1x128xf32>,
    %c0_11 = arith.constant 0 : index
    %c0_12 = arith.constant 0 : index
    %12 = vector.load %arg6[%c0_11, %c0_12] : memref<1x128xf32, #tpu.memory_space<vmem>>, vector<1x128xf32>
    %13 = arith.mulf %2, %2 : vector<128x128xf32>
    %cst_13 = arith.constant dense<0.000000e+00> : vector<128xf32>
    %14 = vector.multi_reduction <add>, %13, %cst_13 [0] : vector<128x128xf32> to vector<128xf32>
    %15 = vector.shape_cast %14 : vector<128xf32> to vector<1x128xf32>
    %16 = arith.addf %12, %15 : vector<1x128xf32>
    %c0_14 = arith.constant 0 : index
    %c0_15 = arith.constant 0 : index
    %17 = vector.load %arg6[%c0_14, %c0_15] : memref<1x128xf32, #tpu.memory_space<vmem>>, vector<1x128xf32>
    tpu.vector_store %arg6[%c0_14, %c0_15], %16 {strides = array<i32>} : memref<1x128xf32, #tpu.memory_space<vmem>>, vector<1x128xf32>,
    return
  }
  func.func @transform_0(%arg0: i32, %arg1: i32) -> (i32, i32) {
    %c0_i32 = arith.constant 0 : i32
    %c0_i32_0 = arith.constant 0 : i32
    return %arg1, %c0_i32 : i32, i32
  }
  func.func @transform_1(%arg0: i32, %arg1: i32) -> (i32, i32) {
    %c0_i32 = arith.constant 0 : i32
    %c0_i32_0 = arith.constant 0 : i32
    return %c0_i32, %arg0 : i32, i32
  }
  func.func @transform_2(%arg0: i32, %arg1: i32) -> (i32, i32) {
    %c0_i32 = arith.constant 0 : i32
    return %arg1, %arg0 : i32, i32
  }
  func.func @transform_3(%arg0: i32, %arg1: i32) -> (i32, i32) {
    %c0_i32 = arith.constant 0 : i32
    %c0_i32_0 = arith.constant 0 : i32
    return %c0_i32, %arg0 : i32, i32
  }
  func.func @transform_4(%arg0: i32, %arg1: i32) -> (i32, i32) {
    %c0_i32 = arith.constant 0 : i32
    %c0_i32_0 = arith.constant 0 : i32
    return %c0_i32, %arg0 : i32, i32
  }
}

module attributes {stable_mosaic.version = 11 : i64} {
  func.func @_matmul_stats_kernel(%arg0: i32, %arg1: i32, %arg2: memref<128x36xbf16, #tpu.memory_space<vmem>>, %arg3: memref<36x128xbf16, #tpu.memory_space<vmem>>, %arg4: memref<128x128xf32, #tpu.memory_space<vmem>>, %arg5: memref<1x128xf32, #tpu.memory_space<vmem>>, %arg6: memref<1x128xf32, #tpu.memory_space<vmem>>) attributes {dimension_semantics = [#tpu.dimension_semantics<parallel>, #tpu.dimension_semantics<arbitrary>], iteration_bounds = array<i64: 1, 1>, scalar_prefetch = 0 : i64, scratch_operands = 0 : i64, tpu.core_type = #tpu.core_type<tc>, window_params = [{transform_indices = @transform_0, window_bounds = array<i64: 128, 36>}, {transform_indices = @transform_1, window_bounds = array<i64: 36, 128>}, {transform_indices = @transform_2, window_bounds = array<i64: 128, 128>}, {transform_indices = @transform_3, window_bounds = array<i64: 1, 128>}, {transform_indices = @transform_4, window_bounds = array<i64: 1, 128>}]} {
    %c0 = arith.constant 0 : index
    %c0_0 = arith.constant 0 : index
    %0 = vector.load %arg2[%c0, %c0_0] : memref<128x36xbf16, #tpu.memory_space<vmem>>, vector<128x36xbf16>
    %c0_1 = arith.constant 0 : index
    %c0_2 = arith.constant 0 : index
    %1 = vector.load %arg3[%c0_1, %c0_2] : memref<36x128xbf16, #tpu.memory_space<vmem>>, vector<36x128xbf16>
    %cst = arith.constant dense<0.000000e+00> : vector<128x128xf32>
    %2 = tpu.matmul %0, %1, %cst {dimension_numbers = #tpu.dot_dimension_numbers<[1], [0], [0], [1], [0, 0, 1, 1], [], []>} : vector<128x36xbf16>, vector<36x128xbf16>, vector<128x128xf32> -> vector<128x128xf32>
    %c0_3 = arith.constant 0 : index
    %c0_4 = arith.constant 0 : index
    %3 = vector.load %arg4[%c0_3, %c0_4] : memref<128x128xf32, #tpu.memory_space<vmem>>, vector<128x128xf32>
    tpu.vector_store %arg4[%c0_3, %c0_4], %2 {strides = array<i32>} : memref<128x128xf32, #tpu.memory_space<vmem>>, vector<128x128xf32>,
    %c0_i32 = arith.constant 0 : i32
    %4 = arith.cmpi eq, %arg1, %c0_i32 : i32
    %5 = arith.extui %4 : i1 to i32
    %c0_i32_5 = arith.constant 0 : i32
    %6 = arith.cmpi ne, %5, %c0_i32_5 : i32
    scf.if %6 {
      %cst_16 = arith.constant 0.000000e+00 : f32
      %18 = vector.broadcast %cst_16 : f32 to vector<1x128xf32>
      %c0_17 = arith.constant 0 : index
      %c0_18 = arith.constant 0 : index
      %19 = vector.load %arg5[%c0_17, %c0_18] : memref<1x128xf32, #tpu.memory_space<vmem>>, vector<1x128xf32>
      tpu.vector_store %arg5[%c0_17, %c0_18], %18 {strides = array<i32>} : memref<1x128xf32, #tpu.memory_space<vmem>>, vector<1x128xf32>,
      %cst_19 = arith.constant 0.000000e+00 : f32
      %20 = vector.broadcast %cst_19 : f32 to vector<1x128xf32>
      %c0_20 = arith.constant 0 : index
      %c0_21 = arith.constant 0 : index
      %21 = vector.load %arg6[%c0_20, %c0_21] : memref<1x128xf32, #tpu.memory_space<vmem>>, vector<1x128xf32>
      tpu.vector_store %arg6[%c0_20, %c0_21], %20 {strides = array<i32>} : memref<1x128xf32, #tpu.memory_space<vmem>>, vector<1x128xf32>,
    } else {
    }
    %c0_6 = arith.constant 0 : index
    %c0_7 = arith.constant 0 : index
    %7 = vector.load %arg5[%c0_6, %c0_7] : memref<1x128xf32, #tpu.memory_space<vmem>>, vector<1x128xf32>
    %cst_8 = arith.constant dense<0.000000e+00> : vector<128xf32>
    %8 = vector.multi_reduction <add>, %2, %cst_8 [0] : vector<128x128xf32> to vector<128xf32>
    %9 = vector.shape_cast %8 : vector<128xf32> to vector<1x128xf32>
    %10 = arith.addf %7, %9 : vector<1x128xf32>
    %c0_9 = arith.constant 0 : index
    %c0_10 = arith.constant 0 : index
    %11 = vector.load %arg5[%c0_9, %c0_10] : memref<1x128xf32, #tpu.memory_space<vmem>>, vector<1x128xf32>
    tpu.vector_store %arg5[%c0_9, %c0_10], %10 {strides = array<i32>} : memref<1x128xf32, #tpu.memory_space<vmem>>, vector<1x128xf32>,
    %c0_11 = arith.constant 0 : index
    %c0_12 = arith.constant 0 : index
    %12 = vector.load %arg6[%c0_11, %c0_12] : memref<1x128xf32, #tpu.memory_space<vmem>>, vector<1x128xf32>
    %13 = arith.mulf %2, %2 : vector<128x128xf32>
    %cst_13 = arith.constant dense<0.000000e+00> : vector<128xf32>
    %14 = vector.multi_reduction <add>, %13, %cst_13 [0] : vector<128x128xf32> to vector<128xf32>
    %15 = vector.shape_cast %14 : vector<128xf32> to vector<1x128xf32>
    %16 = arith.addf %12, %15 : vector<1x128xf32>
    %c0_14 = arith.constant 0 : index
    %c0_15 = arith.constant 0 : index
    %17 = vector.load %arg6[%c0_14, %c0_15] : memref<1x128xf32, #tpu.memory_space<vmem>>, vector<1x128xf32>
    tpu.vector_store %arg6[%c0_14, %c0_15], %16 {strides = array<i32>} : memref<1x128xf32, #tpu.memory_space<vmem>>, vector<1x128xf32>,
    return
  }
  func.func @transform_0(%arg0: i32, %arg1: i32) -> (i32, i32) {
    %c0_i32 = arith.constant 0 : i32
    %c0_i32_0 = arith.constant 0 : i32
    return %arg1, %c0_i32 : i32, i32
  }
  func.func @transform_1(%arg0: i32, %arg1: i32) -> (i32, i32) {
    %c0_i32 = arith.constant 0 : i32
    %c0_i32_0 = arith.constant 0 : i32
    return %c0_i32, %arg0 : i32, i32
  }
  func.func @transform_2(%arg0: i32, %arg1: i32) -> (i32, i32) {
    %c0_i32 = arith.constant 0 : i32
    return %arg1, %arg0 : i32, i32
  }
  func.func @transform_3(%arg0: i32, %arg1: i32) -> (i32, i32) {
    %c0_i32 = arith.constant 0 : i32
    %c0_i32_0 = arith.constant 0 : i32
    return %c0_i32, %arg0 : i32, i32
  }
  func.func @transform_4(%arg0: i32, %arg1: i32) -> (i32, i32) {
    %c0_i32 = arith.constant 0 : i32
    %c0_i32_0 = arith.constant 0 : i32
    return %c0_i32, %arg0 : i32, i32
  }
}

module attributes {stable_mosaic.version = 11 : i64} {
  func.func @_affine_kernel(%arg0: i32, %arg1: i32, %arg2: memref<128x128xf32, #tpu.memory_space<vmem>>, %arg3: memref<1x128xf32, #tpu.memory_space<vmem>>, %arg4: memref<1x128xf32, #tpu.memory_space<vmem>>, %arg5: memref<128x128xbf16, #tpu.memory_space<vmem>>) attributes {dimension_semantics = [#tpu.dimension_semantics<parallel>, #tpu.dimension_semantics<parallel>], iteration_bounds = array<i64: 1, 1>, scalar_prefetch = 0 : i64, scratch_operands = 0 : i64, tpu.core_type = #tpu.core_type<tc>, window_params = [{transform_indices = @transform_0, window_bounds = array<i64: 128, 128>}, {transform_indices = @transform_1, window_bounds = array<i64: 1, 128>}, {transform_indices = @transform_2, window_bounds = array<i64: 1, 128>}, {transform_indices = @transform_3, window_bounds = array<i64: 128, 128>}]} {
    %c0 = arith.constant 0 : index
    %c0_0 = arith.constant 0 : index
    %0 = vector.load %arg2[%c0, %c0_0] : memref<128x128xf32, #tpu.memory_space<vmem>>, vector<128x128xf32>
    %c0_1 = arith.constant 0 : index
    %c0_2 = arith.constant 0 : index
    %1 = vector.load %arg3[%c0_1, %c0_2] : memref<1x128xf32, #tpu.memory_space<vmem>>, vector<1x128xf32>
    %2 = vector.broadcast %1 : vector<1x128xf32> to vector<128x128xf32>
    %3 = arith.mulf %0, %2 : vector<128x128xf32>
    %c0_3 = arith.constant 0 : index
    %c0_4 = arith.constant 0 : index
    %4 = vector.load %arg4[%c0_3, %c0_4] : memref<1x128xf32, #tpu.memory_space<vmem>>, vector<1x128xf32>
    %5 = vector.broadcast %4 : vector<1x128xf32> to vector<128x128xf32>
    %6 = arith.addf %3, %5 : vector<128x128xf32>
    %cst = arith.constant 0.000000e+00 : f32
    %7 = vector.broadcast %cst : f32 to vector<128x128xf32>
    %8 = arith.maximumf %6, %7 : vector<128x128xf32>
    %9 = arith.truncf %8 : vector<128x128xf32> to vector<128x128xbf16>
    %c0_5 = arith.constant 0 : index
    %c0_6 = arith.constant 0 : index
    %10 = vector.load %arg5[%c0_5, %c0_6] : memref<128x128xbf16, #tpu.memory_space<vmem>>, vector<128x128xbf16>
    tpu.vector_store %arg5[%c0_5, %c0_6], %9 {strides = array<i32>} : memref<128x128xbf16, #tpu.memory_space<vmem>>, vector<128x128xbf16>,
    return
  }
  func.func @transform_0(%arg0: i32, %arg1: i32) -> (i32, i32) {
    %c0_i32 = arith.constant 0 : i32
    return %arg1, %arg0 : i32, i32
  }
  func.func @transform_1(%arg0: i32, %arg1: i32) -> (i32, i32) {
    %c0_i32 = arith.constant 0 : i32
    %c0_i32_0 = arith.constant 0 : i32
    return %c0_i32, %arg0 : i32, i32
  }
  func.func @transform_2(%arg0: i32, %arg1: i32) -> (i32, i32) {
    %c0_i32 = arith.constant 0 : i32
    %c0_i32_0 = arith.constant 0 : i32
    return %c0_i32, %arg0 : i32, i32
  }
  func.func @transform_3(%arg0: i32, %arg1: i32) -> (i32, i32) {
    %c0_i32 = arith.constant 0 : i32
    return %arg1, %arg0 : i32, i32
  }
}

module attributes {stable_mosaic.version = 11 : i64} {
  func.func @_matmul_stats_kernel(%arg0: i32, %arg1: i32, %arg2: memref<128x72xbf16, #tpu.memory_space<vmem>>, %arg3: memref<72x128xbf16, #tpu.memory_space<vmem>>, %arg4: memref<128x128xf32, #tpu.memory_space<vmem>>, %arg5: memref<1x128xf32, #tpu.memory_space<vmem>>, %arg6: memref<1x128xf32, #tpu.memory_space<vmem>>) attributes {dimension_semantics = [#tpu.dimension_semantics<parallel>, #tpu.dimension_semantics<arbitrary>], iteration_bounds = array<i64: 1, 1>, scalar_prefetch = 0 : i64, scratch_operands = 0 : i64, tpu.core_type = #tpu.core_type<tc>, window_params = [{transform_indices = @transform_0, window_bounds = array<i64: 128, 72>}, {transform_indices = @transform_1, window_bounds = array<i64: 72, 128>}, {transform_indices = @transform_2, window_bounds = array<i64: 128, 128>}, {transform_indices = @transform_3, window_bounds = array<i64: 1, 128>}, {transform_indices = @transform_4, window_bounds = array<i64: 1, 128>}]} {
    %c0 = arith.constant 0 : index
    %c0_0 = arith.constant 0 : index
    %0 = vector.load %arg2[%c0, %c0_0] : memref<128x72xbf16, #tpu.memory_space<vmem>>, vector<128x72xbf16>
    %c0_1 = arith.constant 0 : index
    %c0_2 = arith.constant 0 : index
    %1 = vector.load %arg3[%c0_1, %c0_2] : memref<72x128xbf16, #tpu.memory_space<vmem>>, vector<72x128xbf16>
    %cst = arith.constant dense<0.000000e+00> : vector<128x128xf32>
    %2 = tpu.matmul %0, %1, %cst {dimension_numbers = #tpu.dot_dimension_numbers<[1], [0], [0], [1], [0, 0, 1, 1], [], []>} : vector<128x72xbf16>, vector<72x128xbf16>, vector<128x128xf32> -> vector<128x128xf32>
    %c0_3 = arith.constant 0 : index
    %c0_4 = arith.constant 0 : index
    %3 = vector.load %arg4[%c0_3, %c0_4] : memref<128x128xf32, #tpu.memory_space<vmem>>, vector<128x128xf32>
    tpu.vector_store %arg4[%c0_3, %c0_4], %2 {strides = array<i32>} : memref<128x128xf32, #tpu.memory_space<vmem>>, vector<128x128xf32>,
    %c0_i32 = arith.constant 0 : i32
    %4 = arith.cmpi eq, %arg1, %c0_i32 : i32
    %5 = arith.extui %4 : i1 to i32
    %c0_i32_5 = arith.constant 0 : i32
    %6 = arith.cmpi ne, %5, %c0_i32_5 : i32
    scf.if %6 {
      %cst_16 = arith.constant 0.000000e+00 : f32
      %18 = vector.broadcast %cst_16 : f32 to vector<1x128xf32>
      %c0_17 = arith.constant 0 : index
      %c0_18 = arith.constant 0 : index
      %19 = vector.load %arg5[%c0_17, %c0_18] : memref<1x128xf32, #tpu.memory_space<vmem>>, vector<1x128xf32>
      tpu.vector_store %arg5[%c0_17, %c0_18], %18 {strides = array<i32>} : memref<1x128xf32, #tpu.memory_space<vmem>>, vector<1x128xf32>,
      %cst_19 = arith.constant 0.000000e+00 : f32
      %20 = vector.broadcast %cst_19 : f32 to vector<1x128xf32>
      %c0_20 = arith.constant 0 : index
      %c0_21 = arith.constant 0 : index
      %21 = vector.load %arg6[%c0_20, %c0_21] : memref<1x128xf32, #tpu.memory_space<vmem>>, vector<1x128xf32>
      tpu.vector_store %arg6[%c0_20, %c0_21], %20 {strides = array<i32>} : memref<1x128xf32, #tpu.memory_space<vmem>>, vector<1x128xf32>,
    } else {
    }
    %c0_6 = arith.constant 0 : index
    %c0_7 = arith.constant 0 : index
    %7 = vector.load %arg5[%c0_6, %c0_7] : memref<1x128xf32, #tpu.memory_space<vmem>>, vector<1x128xf32>
    %cst_8 = arith.constant dense<0.000000e+00> : vector<128xf32>
    %8 = vector.multi_reduction <add>, %2, %cst_8 [0] : vector<128x128xf32> to vector<128xf32>
    %9 = vector.shape_cast %8 : vector<128xf32> to vector<1x128xf32>
    %10 = arith.addf %7, %9 : vector<1x128xf32>
    %c0_9 = arith.constant 0 : index
    %c0_10 = arith.constant 0 : index
    %11 = vector.load %arg5[%c0_9, %c0_10] : memref<1x128xf32, #tpu.memory_space<vmem>>, vector<1x128xf32>
    tpu.vector_store %arg5[%c0_9, %c0_10], %10 {strides = array<i32>} : memref<1x128xf32, #tpu.memory_space<vmem>>, vector<1x128xf32>,
    %c0_11 = arith.constant 0 : index
    %c0_12 = arith.constant 0 : index
    %12 = vector.load %arg6[%c0_11, %c0_12] : memref<1x128xf32, #tpu.memory_space<vmem>>, vector<1x128xf32>
    %13 = arith.mulf %2, %2 : vector<128x128xf32>
    %cst_13 = arith.constant dense<0.000000e+00> : vector<128xf32>
    %14 = vector.multi_reduction <add>, %13, %cst_13 [0] : vector<128x128xf32> to vector<128xf32>
    %15 = vector.shape_cast %14 : vector<128xf32> to vector<1x128xf32>
    %16 = arith.addf %12, %15 : vector<1x128xf32>
    %c0_14 = arith.constant 0 : index
    %c0_15 = arith.constant 0 : index
    %17 = vector.load %arg6[%c0_14, %c0_15] : memref<1x128xf32, #tpu.memory_space<vmem>>, vector<1x128xf32>
    tpu.vector_store %arg6[%c0_14, %c0_15], %16 {strides = array<i32>} : memref<1x128xf32, #tpu.memory_space<vmem>>, vector<1x128xf32>,
    return
  }
  func.func @transform_0(%arg0: i32, %arg1: i32) -> (i32, i32) {
    %c0_i32 = arith.constant 0 : i32
    %c0_i32_0 = arith.constant 0 : i32
    return %arg1, %c0_i32 : i32, i32
  }
  func.func @transform_1(%arg0: i32, %arg1: i32) -> (i32, i32) {
    %c0_i32 = arith.constant 0 : i32
    %c0_i32_0 = arith.constant 0 : i32
    return %c0_i32, %arg0 : i32, i32
  }
  func.func @transform_2(%arg0: i32, %arg1: i32) -> (i32, i32) {
    %c0_i32 = arith.constant 0 : i32
    return %arg1, %arg0 : i32, i32
  }
  func.func @transform_3(%arg0: i32, %arg1: i32) -> (i32, i32) {
    %c0_i32 = arith.constant 0 : i32
    %c0_i32_0 = arith.constant 0 : i32
    return %c0_i32, %arg0 : i32, i32
  }
  func.func @transform_4(%arg0: i32, %arg1: i32) -> (i32, i32) {
    %c0_i32 = arith.constant 0 : i32
    %c0_i32_0 = arith.constant 0 : i32
    return %c0_i32, %arg0 : i32, i32
  }
}

module attributes {stable_mosaic.version = 11 : i64} {
  func.func @_affine_res_relu_kernel(%arg0: i32, %arg1: i32, %arg2: memref<128x128xf32, #tpu.memory_space<vmem>>, %arg3: memref<1x128xf32, #tpu.memory_space<vmem>>, %arg4: memref<1x128xf32, #tpu.memory_space<vmem>>, %arg5: memref<128x128xf32, #tpu.memory_space<vmem>>, %arg6: memref<1x128xf32, #tpu.memory_space<vmem>>, %arg7: memref<1x128xf32, #tpu.memory_space<vmem>>, %arg8: memref<128x128xf32, #tpu.memory_space<vmem>>) attributes {dimension_semantics = [#tpu.dimension_semantics<parallel>, #tpu.dimension_semantics<parallel>], iteration_bounds = array<i64: 1, 1>, scalar_prefetch = 0 : i64, scratch_operands = 0 : i64, tpu.core_type = #tpu.core_type<tc>, window_params = [{transform_indices = @transform_0, window_bounds = array<i64: 128, 128>}, {transform_indices = @transform_1, window_bounds = array<i64: 1, 128>}, {transform_indices = @transform_2, window_bounds = array<i64: 1, 128>}, {transform_indices = @transform_3, window_bounds = array<i64: 128, 128>}, {transform_indices = @transform_4, window_bounds = array<i64: 1, 128>}, {transform_indices = @transform_5, window_bounds = array<i64: 1, 128>}, {transform_indices = @transform_6, window_bounds = array<i64: 128, 128>}]} {
    %c0 = arith.constant 0 : index
    %c0_0 = arith.constant 0 : index
    %0 = vector.load %arg2[%c0, %c0_0] : memref<128x128xf32, #tpu.memory_space<vmem>>, vector<128x128xf32>
    %c0_1 = arith.constant 0 : index
    %c0_2 = arith.constant 0 : index
    %1 = vector.load %arg3[%c0_1, %c0_2] : memref<1x128xf32, #tpu.memory_space<vmem>>, vector<1x128xf32>
    %2 = vector.broadcast %1 : vector<1x128xf32> to vector<128x128xf32>
    %3 = arith.mulf %0, %2 : vector<128x128xf32>
    %c0_3 = arith.constant 0 : index
    %c0_4 = arith.constant 0 : index
    %4 = vector.load %arg4[%c0_3, %c0_4] : memref<1x128xf32, #tpu.memory_space<vmem>>, vector<1x128xf32>
    %5 = vector.broadcast %4 : vector<1x128xf32> to vector<128x128xf32>
    %6 = arith.addf %3, %5 : vector<128x128xf32>
    %c0_5 = arith.constant 0 : index
    %c0_6 = arith.constant 0 : index
    %7 = vector.load %arg5[%c0_5, %c0_6] : memref<128x128xf32, #tpu.memory_space<vmem>>, vector<128x128xf32>
    %c0_7 = arith.constant 0 : index
    %c0_8 = arith.constant 0 : index
    %8 = vector.load %arg6[%c0_7, %c0_8] : memref<1x128xf32, #tpu.memory_space<vmem>>, vector<1x128xf32>
    %9 = vector.broadcast %8 : vector<1x128xf32> to vector<128x128xf32>
    %10 = arith.mulf %7, %9 : vector<128x128xf32>
    %c0_9 = arith.constant 0 : index
    %c0_10 = arith.constant 0 : index
    %11 = vector.load %arg7[%c0_9, %c0_10] : memref<1x128xf32, #tpu.memory_space<vmem>>, vector<1x128xf32>
    %12 = vector.broadcast %11 : vector<1x128xf32> to vector<128x128xf32>
    %13 = arith.addf %10, %12 : vector<128x128xf32>
    %14 = arith.addf %6, %13 : vector<128x128xf32>
    %cst = arith.constant 0.000000e+00 : f32
    %15 = vector.broadcast %cst : f32 to vector<128x128xf32>
    %16 = arith.maximumf %14, %15 : vector<128x128xf32>
    %c0_11 = arith.constant 0 : index
    %c0_12 = arith.constant 0 : index
    %17 = vector.load %arg8[%c0_11, %c0_12] : memref<128x128xf32, #tpu.memory_space<vmem>>, vector<128x128xf32>
    tpu.vector_store %arg8[%c0_11, %c0_12], %16 {strides = array<i32>} : memref<128x128xf32, #tpu.memory_space<vmem>>, vector<128x128xf32>,
    return
  }
  func.func @transform_0(%arg0: i32, %arg1: i32) -> (i32, i32) {
    %c0_i32 = arith.constant 0 : i32
    return %arg1, %arg0 : i32, i32
  }
  func.func @transform_1(%arg0: i32, %arg1: i32) -> (i32, i32) {
    %c0_i32 = arith.constant 0 : i32
    %c0_i32_0 = arith.constant 0 : i32
    return %c0_i32, %arg0 : i32, i32
  }
  func.func @transform_2(%arg0: i32, %arg1: i32) -> (i32, i32) {
    %c0_i32 = arith.constant 0 : i32
    %c0_i32_0 = arith.constant 0 : i32
    return %c0_i32, %arg0 : i32, i32
  }
  func.func @transform_3(%arg0: i32, %arg1: i32) -> (i32, i32) {
    %c0_i32 = arith.constant 0 : i32
    return %arg1, %arg0 : i32, i32
  }
  func.func @transform_4(%arg0: i32, %arg1: i32) -> (i32, i32) {
    %c0_i32 = arith.constant 0 : i32
    %c0_i32_0 = arith.constant 0 : i32
    return %c0_i32, %arg0 : i32, i32
  }
  func.func @transform_5(%arg0: i32, %arg1: i32) -> (i32, i32) {
    %c0_i32 = arith.constant 0 : i32
    %c0_i32_0 = arith.constant 0 : i32
    return %c0_i32, %arg0 : i32, i32
  }
  func.func @transform_6(%arg0: i32, %arg1: i32) -> (i32, i32) {
    %c0_i32 = arith.constant 0 : i32
    return %arg1, %arg0 : i32, i32
  }
}

</mosaic_0001>

<bundles_post_ra>
// kernel: basic_block_forward.7
= control target key start
LH: loop header
LB: loop body
LE: loop exit
PB: predicated region body
PF: predicated region fallthrough
CT: control target
= control target key end

     0   :  { %vm97_vm0 = vcmask 1041408   ;;  %vm72_vm1 = vcmask 31744   ;;  %v352_v10 = vmov 0.0   ;;  %s479_s1 = inlined_call_operand.vmem [shape: bf16[4,128], index: 1, kind: input, shape index: {}]   ;;  %s480_s0 = inlined_call_operand.vmem [shape: bf16[128,4], index: 0, kind: input, shape index: {}]   ;;  %s481_s3 = inlined_call_operand.vmem [shape: f32[1,128], index: 3, kind: output, shape index: {1}]   ;;  %s482_s4 = inlined_call_operand.vmem [shape: f32[1,128], index: 4, kind: output, shape index: {2}]   ;;  %s483_s2 = inlined_call_operand.vmem [shape: f32[128,128], index: 2, kind: output, shape index: {0}]  }
   0x1   :  { %v31_v0 = vld [vmem:[%s479_s1] sm:$0x3]  ;;  %v345_v3 = vld [vmem:[%s480_s0 + $0x8] sm:$0xff]   ;;  %v346_v4 = vld [vmem:[%s480_s0 + $0x10] sm:$0xff]   ;;  %218 = vst [vmem:[%s481_s3] sm:$0x1] %v352_v10 }
   0x2   :  { %341 = vmatprep.subr.msk.bf16.mxu0 %vm97_vm0, %v31_v0  ;;  %v99_v1 = vsel %vm97_vm0, %v31_v0, 0  ;;  %v344_v2 = vld [vmem:[%s480_s0] sm:$0xff]   ;;  %342 = vmatprep.subr.msk.bf16.mxu1 %vm97_vm0, %v31_v0  ;;  %v349_v6 = vld [vmem:[%s480_s0 + $0x28] sm:$0xff]   ;;  %v350_v7 = vld [vmem:[%s480_s0 + $0x30] sm:$0xff]   ;;  %219 = vst [vmem:[%s482_s4] sm:$0x1] %v352_v10 }
   0x3   :  { %322 = vmatpush3.bf16.msra.mxu0 %v99_v1  ;;  %340 = vmatpush3.bf16.msra.mxu1 %v99_v1  ;;  %v348_v5 = vld [vmem:[%s480_s0 + $0x20] sm:$0xff]   ;;  %v347_v8 = vld [vmem:[%s480_s0 + $0x18] sm:$0xff]  }
   0x4   :  { %323 = vmatprep.mubr.msk.bf16.mxu0 %vm72_vm1, %v344_v2  ;;  %331 = vmatprep.mubr.msk.bf16.mxu1 %vm72_vm1, %v348_v5  ;;  %v351_v9 = vld [vmem:[%s480_s0 + $0x38] sm:$0xff]  }
   0x6   :  { %324 = vmatmul.mubr.msk.bf16.vlgmr.msra.gmra.mxu0 %vm72_vm1, %v345_v3  ;;  %332 = vmatmul.mubr.msk.bf16.vlgmr.msra.gmra.mxu1 %vm72_vm1, %v349_v6 }
   0x7   :  { %327 = vmatprep.mubr.msk.bf16.mxu0 %vm72_vm1, %v346_v4  ;;  %335 = vmatprep.mubr.msk.bf16.mxu1 %vm72_vm1, %v350_v7 }
   0xe   :  { %328 = vmatmul.mubr.msk.bf16.gmra.mxu0 %vm72_vm1, %v347_v8  ;;  %336 = vmatmul.mubr.msk.bf16.gmra.mxu1 %vm72_vm1, %v351_v9 }
  0xc6   :  { %v325_v11 = vpop.f32.mrf.mxu0  ;;  %v333_v13 = vpop.f32.mrf.mxu1 }
  0xc7   :  { %200 = vst [vmem:[%s483_s2 + $0x10] sm:$0xff] %v325_v11  ;;  %208 = vst [vmem:[%s483_s2 + $0x50] sm:$0xff] %v333_v13  ;;  %v247_v22 = vmul.f32 %v325_v11, %v325_v11  ;;  %v255_v54 = vmul.f32 %v333_v13, %v333_v13 }
  0xc8   :  { %v135_v12 = vpop.f32.mrf.mxu0  ;;  %v167_v15 = vpop.f32.mrf.mxu1 }
  0xc9   :  { %198 = vst [vmem:[%s483_s2] sm:$0xff] %v135_v12  ;;  %206 = vst [vmem:[%s483_s2 + $0x40] sm:$0xff] %v167_v15  ;;  %v245_v17 = vmul.f32 %v135_v12, %v135_v12  ;;  %v253_v48 = vmul.f32 %v167_v15, %v167_v15 }
  0xca   :  { %v326_v14 = vpop.f32.mrf.mxu0  ;;  %v334_v20 = vpop.f32.mrf.mxu1 }
  0xcb   :  { %201 = vst [vmem:[%s483_s2 + $0x18] sm:$0xff] %v326_v14  ;;  %209 = vst [vmem:[%s483_s2 + $0x58] sm:$0xff] %v334_v20  ;;  %v248_v27 = vmul.f32 %v326_v14, %v326_v14  ;;  %v256_v57 = vmul.f32 %v334_v20, %v334_v20 }
  0xcc   :  { %v138_v16 = vpop.f32.mrf.mxu0  ;;  %v170_v25 = vpop.f32.mrf.mxu1 }
  0xcd   :  { %199 = vst [vmem:[%s483_s2 + $0x8] sm:$0xff] %v138_v16  ;;  %v221_v18 = vadd.f32 %v138_v16, %v135_v12  ;;  %v246_v19 = vmul.f32 %v138_v16, %v138_v16  ;;  %207 = vst [vmem:[%s483_s2 + $0x48] sm:$0xff] %v170_v25  ;;  %v254_v52 = vmul.f32 %v170_v25, %v170_v25 }
  0xce   :  { %v329_v21 = vpop.f32.mrf.mxu0  ;;  %v337_v30 = vpop.f32.mrf.mxu1 }
  0xcf   :  { %v222_v23 = vadd.f32 %v325_v11, %v221_v18  ;;  %v261_v24 = vadd.f32 %v246_v19, %v245_v17  ;;  %204 = vst [vmem:[%s483_s2 + $0x30] sm:$0xff] %v329_v21  ;;  %212 = vst [vmem:[%s483_s2 + $0x70] sm:$0xff] %v337_v30  ;;  %v251_v41 = vmul.f32 %v329_v21, %v329_v21  ;;  %v220_v18 = vld [vmem:[%s481_s3] sm:$0x1] }
  0xd0   :  { %v151_v26 = vpop.f32.mrf.mxu0  ;;  %v183_v35 = vpop.f32.mrf.mxu1  ;;  %v259_v2 = vmul.f32 %v337_v30, %v337_v30 }
  0xd1   :  { %v262_v28 = vadd.f32 %v261_v24, %v247_v22  ;;  %202 = vst [vmem:[%s483_s2 + $0x20] sm:$0xff] %v151_v26  ;;  %v223_v29 = vadd.f32 %v326_v14, %v222_v23  ;;  %v249_v33 = vmul.f32 %v151_v26, %v151_v26  ;;  %210 = vst [vmem:[%s483_s2 + $0x60] sm:$0xff] %v183_v35 }
  0xd2   :  { %v330_v31 = vpop.f32.mrf.mxu0  ;;  %v338_v40 = vpop.f32.mrf.mxu1  ;;  %v257_v61 = vmul.f32 %v183_v35, %v183_v35 }
  0xd3   :  { %v224_v32 = vadd.f32 %v223_v29, %v151_v26  ;;  %v263_v34 = vadd.f32 %v262_v28, %v248_v27  ;;  %205 = vst [vmem:[%s483_s2 + $0x38] sm:$0xff] %v330_v31  ;;  %213 = vst [vmem:[%s483_s2 + $0x78] sm:$0xff] %v338_v40  ;;  %v252_v45 = vmul.f32 %v330_v31, %v330_v31 }
  0xd4   :  { %v154_v36 = vpop.f32.mrf.mxu0  ;;  %v186_v44 = vpop.f32.mrf.mxu1  ;;  %v260_v5 = vmul.f32 %v338_v40, %v338_v40 }
  0xd5   :  { %v264_v37 = vadd.f32 %v263_v34, %v249_v33  ;;  %203 = vst [vmem:[%s483_s2 + $0x28] sm:$0xff] %v154_v36  ;;  %v225_v38 = vadd.f32 %v224_v32, %v154_v36  ;;  %v250_v39 = vmul.f32 %v154_v36, %v154_v36  ;;  %211 = vst [vmem:[%s483_s2 + $0x68] sm:$0xff] %v186_v44 }
  0xd6   :  { %v258_v1 = vmul.f32 %v186_v44, %v186_v44 }
  0xd7   :  { %v226_v42 = vadd.f32 %v329_v21, %v225_v38  ;;  %v265_v43 = vadd.f32 %v264_v37, %v250_v39  ;;  %v244_v21 = vld [vmem:[%s482_s4] sm:$0x1] }
  0xd9   :  { %v227_v46 = vadd.f32 %v330_v31, %v226_v42  ;;  %v266_v47 = vadd.f32 %v265_v43, %v251_v41 }
  0xdb   :  { %v267_v49 = vadd.f32 %v266_v47, %v252_v45  ;;  %v228_v50 = vadd.f32 %v227_v46, %v167_v15 }
  0xdd   :  { %v229_v51 = vadd.f32 %v228_v50, %v170_v25  ;;  %v268_v53 = vadd.f32 %v267_v49, %v253_v48 }
  0xdf   :  { %v230_v55 = vadd.f32 %v333_v13, %v229_v51  ;;  %v269_v56 = vadd.f32 %v268_v53, %v254_v52 }
  0xe1   :  { %v270_v58 = vadd.f32 %v269_v56, %v255_v54  ;;  %v231_v59 = vadd.f32 %v334_v20, %v230_v55 }
  0xe3   :  { %v232_v60 = vadd.f32 %v231_v59, %v183_v35  ;;  %v271_v62 = vadd.f32 %v270_v58, %v256_v57 }
  0xe5   :  { %v272_v63 = vadd.f32 %v271_v62, %v257_v61  ;;  %v233_v0 = vadd.f32 %v232_v60, %v186_v44 }
  0xe7   :  { %v234_v3 = vadd.f32 %v337_v30, %v233_v0  ;;  %v273_v4 = vadd.f32 %v272_v63, %v258_v1 }
  0xe9   :  { %v235_v6 = vadd.f32 %v338_v40, %v234_v3  ;;  %v274_v7 = vadd.f32 %v273_v4, %v259_v2 }
  0xeb   :  { %v236_v8 = vrot.slane %v235_v6, 4  ;;  %v275_v9 = vadd.f32 %v274_v7, %v260_v5 }
  0xed   :  { %v237_v10 = vadd.f32 %v236_v8, %v235_v6  ;;  %v276_v11 = vrot.slane %v275_v9, 4 }
  0xef   :  { %v238_v12 = vrot.slane %v237_v10, 2  ;;  %v277_v13 = vadd.f32 %v276_v11, %v275_v9 }
  0xf1   :  { %v239_v14 = vadd.f32 %v238_v12, %v237_v10  ;;  %v278_v15 = vrot.slane %v277_v13, 2 }
  0xf3   :  { %v240_v16 = vrot.slane %v239_v14, 1  ;;  %v279_v17 = vadd.f32 %v278_v15, %v277_v13 }
  0xf5   :  { %v241_v19 = vadd.f32 %v240_v16, %v239_v14  ;;  %v280_v20 = vrot.slane %v279_v17, 1 }
  0xf7   :  { %v242_v22 = vadd.f32 %v241_v19, %v220_v18  ;;  %v281_v23 = vadd.f32 %v280_v20, %v279_v17 }
  0xf9   :  { %243 = vst [vmem:[%s481_s3] sm:$0x1] %v242_v22  ;;  %v282_v24 = vadd.f32 %v281_v23, %v244_v21 }
  0xfb   :  { %283 = vst [vmem:[%s482_s4] sm:$0x1] %v282_v24 }

// kernel: basic_block_forward.5
= control target key start
LH: loop header
LB: loop body
LE: loop exit
PB: predicated region body
PF: predicated region fallthrough
CT: control target
= control target key end

     0   :  { %vm116_vm0 = vcmask 1041408   ;;  %vm91_vm1 = vcmask 293888   ;;  %v387_v12 = vmov 0.0   ;;  %s520_s1 = inlined_call_operand.vmem [shape: bf16[36,128], index: 1, kind: input, shape index: {}]   ;;  %s521_s0 = inlined_call_operand.vmem [shape: bf16[128,36], index: 0, kind: input, shape index: {}]   ;;  %s522_s3 = inlined_call_operand.vmem [shape: f32[1,128], index: 3, kind: output, shape index: {1}]   ;;  %s523_s4 = inlined_call_operand.vmem [shape: f32[1,128], index: 4, kind: output, shape index: {2}]   ;;  %s524_s2 = inlined_call_operand.vmem [shape: f32[128,128], index: 2, kind: output, shape index: {0}]  }
   0x1   :  { %v376_v0 = vld [vmem:[%s520_s1 + $0x10] ss:$0 sps:$4 sm:$0x33]   ;;  %v377_v1 = vld [vmem:[%s520_s1 + $0x8] sm:$0xff]   ;;  %v379_v3 = vld [vmem:[%s521_s0] sm:$0xff]   ;;  %237 = vst [vmem:[%s522_s3] sm:$0x1] %v387_v12 }
   0x2   :  { %373 = vmatprep.subr.msk.bf16.mxu0 %vm116_vm0, %v376_v0  ;;  %v118_v2 = vsel %vm116_vm0, %v376_v0, 0  ;;  %374 = vmatprep.subr.msk.bf16.mxu1 %vm116_vm0, %v376_v0  ;;  %v378_v4 = vld [vmem:[%s520_s1] sm:$0xff]   ;;  %v380_v6 = vld [vmem:[%s521_s0 + $0x8] sm:$0xff]   ;;  %v381_v8 = vld [vmem:[%s521_s0 + $0x10] sm:$0xff]   ;;  %238 = vst [vmem:[%s523_s4] sm:$0x1] %v387_v12 }
   0x3   :  { %346 = vmatpush3.bf16.msra.mxu0 %v118_v2  ;;  %370 = vmatpush3.bf16.msra.mxu1 %v118_v2  ;;  %v383_v5 = vld [vmem:[%s521_s0 + $0x20] sm:$0xff]   ;;  %v384_v7 = vld [vmem:[%s521_s0 + $0x28] sm:$0xff]   ;;  %v385_v9 = vld [vmem:[%s521_s0 + $0x30] sm:$0xff]  }
   0x4   :  { %347 = vmatprep.subr.bf16.mxu0 %v377_v1  ;;  %368 = vmatprep.subr.bf16.mxu1 %v377_v1  ;;  %v382_v10 = vld [vmem:[%s521_s0 + $0x18] sm:$0xff]  }
   0x5   :  { %351 = vmatprep.mubr.msk.bf16.mxu0 %vm91_vm1, %v379_v3  ;;  %359 = vmatprep.mubr.msk.bf16.mxu1 %vm91_vm1, %v383_v5  ;;  %v386_v11 = vld [vmem:[%s521_s0 + $0x38] sm:$0xff]  }
   0x7   :  { %348 = vmatpush3.bf16.msra.mxu0 %v377_v1  ;;  %371 = vmatpush3.bf16.msra.mxu1 %v377_v1 }
   0x8   :  { %349 = vmatprep.subr.bf16.mxu0 %v378_v4  ;;  %369 = vmatprep.subr.bf16.mxu1 %v378_v4 }
   0xb   :  { %350 = vmatpush3.bf16.msra.mxu0 %v378_v4  ;;  %372 = vmatpush3.bf16.msra.mxu1 %v378_v4 }
   0xe   :  { %352 = vmatmul.mubr.msk.bf16.vlgmr.msra.gmra.mxu0 %vm91_vm1, %v380_v6  ;;  %360 = vmatmul.mubr.msk.bf16.vlgmr.msra.gmra.mxu1 %vm91_vm1, %v384_v7 }
   0xf   :  { %355 = vmatprep.mubr.msk.bf16.mxu0 %vm91_vm1, %v381_v8  ;;  %363 = vmatprep.mubr.msk.bf16.mxu1 %vm91_vm1, %v385_v9 }
  0x16   :  { %356 = vmatmul.mubr.msk.bf16.gmra.mxu0 %vm91_vm1, %v382_v10  ;;  %364 = vmatmul.mubr.msk.bf16.gmra.mxu1 %vm91_vm1, %v386_v11 }
  0xce   :  { %v353_v13 = vpop.f32.mrf.mxu0  ;;  %v361_v14 = vpop.f32.mrf.mxu1 }
  0xcf   :  { %219 = vst [vmem:[%s524_s2 + $0x10] sm:$0xff] %v353_v13  ;;  %227 = vst [vmem:[%s524_s2 + $0x50] sm:$0xff] %v361_v14  ;;  %v266_v26 = vmul.f32 %v353_v13, %v353_v13  ;;  %v274_v56 = vmul.f32 %v361_v14, %v361_v14 }
  0xd0   :  { %v154_v15 = vpop.f32.mrf.mxu0  ;;  %v186_v16 = vpop.f32.mrf.mxu1 }
  0xd1   :  { %217 = vst [vmem:[%s524_s2] sm:$0xff] %v154_v15  ;;  %225 = vst [vmem:[%s524_s2 + $0x40] sm:$0xff] %v186_v16  ;;  %v264_v21 = vmul.f32 %v154_v15, %v154_v15  ;;  %v272_v50 = vmul.f32 %v186_v16, %v186_v16 }
  0xd2   :  { %v354_v17 = vpop.f32.mrf.mxu0  ;;  %v362_v18 = vpop.f32.mrf.mxu1 }
  0xd3   :  { %220 = vst [vmem:[%s524_s2 + $0x18] sm:$0xff] %v354_v17  ;;  %228 = vst [vmem:[%s524_s2 + $0x58] sm:$0xff] %v362_v18  ;;  %v267_v31 = vmul.f32 %v354_v17, %v354_v17  ;;  %v275_v59 = vmul.f32 %v362_v18, %v362_v18 }
  0xd4   :  { %v157_v19 = vpop.f32.mrf.mxu0  ;;  %v189_v20 = vpop.f32.mrf.mxu1 }
  0xd5   :  { %218 = vst [vmem:[%s524_s2 + $0x8] sm:$0xff] %v157_v19  ;;  %v240_v22 = vadd.f32 %v157_v19, %v154_v15  ;;  %v265_v23 = vmul.f32 %v157_v19, %v157_v19  ;;  %226 = vst [vmem:[%s524_s2 + $0x48] sm:$0xff] %v189_v20  ;;  %v273_v54 = vmul.f32 %v189_v20, %v189_v20 }
  0xd6   :  { %v357_v24 = vpop.f32.mrf.mxu0  ;;  %v365_v25 = vpop.f32.mrf.mxu1 }
  0xd7   :  { %v241_v27 = vadd.f32 %v353_v13, %v240_v22  ;;  %v280_v28 = vadd.f32 %v265_v23, %v264_v21  ;;  %223 = vst [vmem:[%s524_s2 + $0x30] sm:$0xff] %v357_v24  ;;  %231 = vst [vmem:[%s524_s2 + $0x70] sm:$0xff] %v365_v25  ;;  %v270_v44 = vmul.f32 %v357_v24, %v357_v24  ;;  %v263_v23 = vld [vmem:[%s523_s4] sm:$0x1] }
  0xd8   :  { %v170_v29 = vpop.f32.mrf.mxu0  ;;  %v202_v30 = vpop.f32.mrf.mxu1  ;;  %v278_v4 = vmul.f32 %v365_v25, %v365_v25 }
  0xd9   :  { %v281_v32 = vadd.f32 %v280_v28, %v266_v26  ;;  %221 = vst [vmem:[%s524_s2 + $0x20] sm:$0xff] %v170_v29  ;;  %v242_v33 = vadd.f32 %v354_v17, %v241_v27  ;;  %229 = vst [vmem:[%s524_s2 + $0x60] sm:$0xff] %v202_v30  ;;  %v268_v37 = vmul.f32 %v170_v29, %v170_v29 }
  0xda   :  { %v358_v34 = vpop.f32.mrf.mxu0  ;;  %v366_v35 = vpop.f32.mrf.mxu1  ;;  %v276_v63 = vmul.f32 %v202_v30, %v202_v30 }
  0xdb   :  { %v243_v36 = vadd.f32 %v242_v33, %v170_v29  ;;  %v282_v38 = vadd.f32 %v281_v32, %v267_v31  ;;  %224 = vst [vmem:[%s524_s2 + $0x38] sm:$0xff] %v358_v34  ;;  %232 = vst [vmem:[%s524_s2 + $0x78] sm:$0xff] %v366_v35  ;;  %v271_v47 = vmul.f32 %v358_v34, %v358_v34 }
  0xdc   :  { %v173_v39 = vpop.f32.mrf.mxu0  ;;  %v205_v40 = vpop.f32.mrf.mxu1  ;;  %v279_v7 = vmul.f32 %v366_v35, %v366_v35 }
  0xdd   :  { %v283_v41 = vadd.f32 %v282_v38, %v268_v37  ;;  %222 = vst [vmem:[%s524_s2 + $0x28] sm:$0xff] %v173_v39  ;;  %v244_v42 = vadd.f32 %v243_v36, %v173_v39  ;;  %v269_v43 = vmul.f32 %v173_v39, %v173_v39  ;;  %230 = vst [vmem:[%s524_s2 + $0x68] sm:$0xff] %v205_v40 }
  0xde   :  { %v277_v3 = vmul.f32 %v205_v40, %v205_v40 }
  0xdf   :  { %v245_v45 = vadd.f32 %v357_v24, %v244_v42  ;;  %v284_v46 = vadd.f32 %v283_v41, %v269_v43 }
  0xe1   :  { %v246_v48 = vadd.f32 %v358_v34, %v245_v45  ;;  %v285_v49 = vadd.f32 %v284_v46, %v270_v44 }
  0xe3   :  { %v286_v51 = vadd.f32 %v285_v49, %v271_v47  ;;  %v247_v52 = vadd.f32 %v246_v48, %v186_v16 }
  0xe5   :  { %v248_v53 = vadd.f32 %v247_v52, %v189_v20  ;;  %v287_v55 = vadd.f32 %v286_v51, %v272_v50  ;;  %v239_v20 = vld [vmem:[%s522_s3] sm:$0x1] }
  0xe7   :  { %v249_v57 = vadd.f32 %v361_v14, %v248_v53  ;;  %v288_v58 = vadd.f32 %v287_v55, %v273_v54 }
  0xe9   :  { %v289_v60 = vadd.f32 %v288_v58, %v274_v56  ;;  %v250_v61 = vadd.f32 %v362_v18, %v249_v57 }
  0xeb   :  { %v251_v62 = vadd.f32 %v250_v61, %v202_v30  ;;  %v290_v0 = vadd.f32 %v289_v60, %v275_v59 }
  0xed   :  { %v291_v1 = vadd.f32 %v290_v0, %v276_v63  ;;  %v252_v2 = vadd.f32 %v251_v62, %v205_v40 }
  0xef   :  { %v253_v5 = vadd.f32 %v365_v25, %v252_v2  ;;  %v292_v6 = vadd.f32 %v291_v1, %v277_v3 }
  0xf1   :  { %v254_v8 = vadd.f32 %v366_v35, %v253_v5  ;;  %v293_v9 = vadd.f32 %v292_v6, %v278_v4 }
  0xf3   :  { %v255_v10 = vrot.slane %v254_v8, 4  ;;  %v294_v11 = vadd.f32 %v293_v9, %v279_v7 }
  0xf5   :  { %v256_v12 = vadd.f32 %v255_v10, %v254_v8  ;;  %v295_v13 = vrot.slane %v294_v11, 4 }
  0xf7   :  { %v257_v14 = vrot.slane %v256_v12, 2  ;;  %v296_v15 = vadd.f32 %v295_v13, %v294_v11 }
  0xf9   :  { %v258_v16 = vadd.f32 %v257_v14, %v256_v12  ;;  %v297_v17 = vrot.slane %v296_v15, 2 }
  0xfb   :  { %v259_v18 = vrot.slane %v258_v16, 1  ;;  %v298_v19 = vadd.f32 %v297_v17, %v296_v15 }
  0xfd   :  { %v260_v21 = vadd.f32 %v259_v18, %v258_v16  ;;  %v299_v22 = vrot.slane %v298_v19, 1 }
  0xff   :  { %v261_v24 = vadd.f32 %v260_v21, %v239_v20  ;;  %v300_v25 = vadd.f32 %v299_v22, %v298_v19 }
 0x101   :  { %262 = vst [vmem:[%s522_s3] sm:$0x1] %v261_v24  ;;  %v301_v26 = vadd.f32 %v300_v25, %v263_v23 }
 0x103   :  { %302 = vst [vmem:[%s523_s4] sm:$0x1] %v301_v26 }

// kernel: basic_block_forward.6
= control target key start
LH: loop header
LB: loop body
LE: loop exit
PB: predicated region body
PF: predicated region fallthrough
CT: control target
= control target key end

     0   :  { %s391_s0 = inlined_call_operand.vmem [shape: f32[128,128], index: 0, kind: input, shape index: {}]   ;;  %s392_s1 = inlined_call_operand.vmem [shape: f32[1,128], index: 1, kind: input, shape index: {}]   ;;  %s393_s2 = inlined_call_operand.vmem [shape: f32[1,128], index: 2, kind: input, shape index: {}]   ;;  %s394_s3 = inlined_call_operand.vmem [shape: bf16[128,128], index: 3, kind: output, shape index: {}]  }
   0x1   :  { %v14_v0 = vld [vmem:[%s391_s0] sm:$0xff]  ;;  %v15_v1 = vld [vmem:[%s391_s0 + $0x8] sm:$0xff]  ;;  %v16_v6 = vld [vmem:[%s391_s0 + $0x10] sm:$0xff] }
   0x2   :  { %v286_v2 = vld [vmem:[%s392_s1] ss:$0 sm:$0xff]  ;;  %v17_v7 = vld [vmem:[%s391_s0 + $0x18] sm:$0xff]  ;;  %v19_v11 = vld [vmem:[%s391_s0 + $0x28] sm:$0xff] }
   0x3   :  { %v37_v3 = vmul.f32 %v286_v2, %v14_v0  ;;  %v38_v4 = vmul.f32 %v286_v2, %v15_v1  ;;  %v293_v5 = vld [vmem:[%s393_s2] ss:$0 sm:$0xff]  ;;  %v39_v8 = vmul.f32 %v286_v2, %v16_v6  ;;  %v40_v9 = vmul.f32 %v286_v2, %v17_v7  ;;  %v20_v12 = vld [vmem:[%s391_s0 + $0x30] sm:$0xff]  ;;  %v21_v17 = vld [vmem:[%s391_s0 + $0x38] sm:$0xff] }
   0x4   :  { %v18_v10 = vld [vmem:[%s391_s0 + $0x20] sm:$0xff]  ;;  %v42_v16 = vmul.f32 %v286_v2, %v19_v11  ;;  %v43_v20 = vmul.f32 %v286_v2, %v20_v12  ;;  %v44_v21 = vmul.f32 %v286_v2, %v21_v17  ;;  %v23_v27 = vld [vmem:[%s391_s0 + $0x48] sm:$0xff]  ;;  %v24_v32 = vld [vmem:[%s391_s0 + $0x50] sm:$0xff] }
   0x5   :  { %v60_v13 = vadd.f32 %v293_v5, %v37_v3  ;;  %v61_v14 = vadd.f32 %v293_v5, %v38_v4  ;;  %v41_v15 = vmul.f32 %v286_v2, %v18_v10  ;;  %v62_v18 = vadd.f32 %v293_v5, %v39_v8  ;;  %v22_v22 = vld [vmem:[%s391_s0 + $0x40] sm:$0xff]  ;;  %v25_v33 = vld [vmem:[%s391_s0 + $0x58] sm:$0xff]  ;;  %v27_v39 = vld [vmem:[%s391_s0 + $0x68] sm:$0xff] }
   0x6   :  { %v63_v19 = vadd.f32 %v293_v5, %v40_v9  ;;  %v65_v26 = vadd.f32 %v293_v5, %v42_v16  ;;  %v66_v30 = vadd.f32 %v293_v5, %v43_v20  ;;  %v67_v31 = vadd.f32 %v293_v5, %v44_v21  ;;  %v26_v38 = vld [vmem:[%s391_s0 + $0x60] sm:$0xff]  ;;  %v28_v44 = vld [vmem:[%s391_s0 + $0x70] sm:$0xff]  ;;  %v29_v49 = vld [vmem:[%s391_s0 + $0x78] sm:$0xff] }
   0x7   :  { %v76_v23 = vmax.f32 %v60_v13, 0.0  ;;  %v77_v24 = vmax.f32 %v61_v14, 0.0  ;;  %v64_v25 = vadd.f32 %v293_v5, %v41_v15  ;;  %v78_v28 = vmax.f32 %v62_v18, 0.0 }
   0x8   :  { %v79_v29 = vmax.f32 %v63_v19, 0.0  ;;  %v81_v36 = vmax.f32 %v65_v26, 0.0  ;;  %v45_v37 = vmul.f32 %v286_v2, %v22_v22  ;;  %v82_v41 = vmax.f32 %v66_v30, 0.0 }
   0x9   :  { %v213_v34 = vpack.c.bf16 %v77_v24, %v76_v23  ;;  %v80_v35 = vmax.f32 %v64_v25, 0.0  ;;  %v83_v42 = vmax.f32 %v67_v31, 0.0  ;;  %v46_v43 = vmul.f32 %v286_v2, %v23_v27 }
   0xa   :  { %v218_v40 = vpack.c.bf16 %v79_v29, %v78_v28  ;;  %v68_v46 = vadd.f32 %v293_v5, %v45_v37  ;;  %v47_v47 = vmul.f32 %v286_v2, %v24_v32  ;;  %v48_v48 = vmul.f32 %v286_v2, %v25_v33 }
   0xb   :  { %214 = vst [vmem:[%s394_s3] sm:$0xff] %v213_v34   ;;  %v223_v45 = vpack.c.bf16 %v81_v36, %v80_v35  ;;  %v228_v50 = vpack.c.bf16 %v83_v42, %v82_v41  ;;  %v69_v51 = vadd.f32 %v293_v5, %v46_v43  ;;  %v49_v52 = vmul.f32 %v286_v2, %v26_v38 }
   0xc   :  { %250 = vst [vmem:[%s394_s3 + $0x8] sm:$0xff] %v218_v40   ;;  %v50_v53 = vmul.f32 %v286_v2, %v27_v39  ;;  %v84_v54 = vmax.f32 %v68_v46, 0.0  ;;  %v70_v55 = vadd.f32 %v293_v5, %v47_v47  ;;  %v71_v56 = vadd.f32 %v293_v5, %v48_v48 }
   0xd   :  { %251 = vst [vmem:[%s394_s3 + $0x10] sm:$0xff] %v223_v45   ;;  %v51_v57 = vmul.f32 %v286_v2, %v28_v44  ;;  %252 = vst [vmem:[%s394_s3 + $0x18] sm:$0xff] %v228_v50   ;;  %v85_v58 = vmax.f32 %v69_v51, 0.0  ;;  %v72_v59 = vadd.f32 %v293_v5, %v49_v52  ;;  %v52_v61 = vmul.f32 %v286_v2, %v29_v49 }
   0xe   :  { %v73_v60 = vadd.f32 %v293_v5, %v50_v53  ;;  %v86_v62 = vmax.f32 %v70_v55, 0.0  ;;  %v87_v63 = vmax.f32 %v71_v56, 0.0 }
   0xf   :  { %v74_v0 = vadd.f32 %v293_v5, %v51_v57  ;;  %v233_v1 = vpack.c.bf16 %v85_v58, %v84_v54  ;;  %v88_v3 = vmax.f32 %v72_v59, 0.0  ;;  %v75_v6 = vadd.f32 %v293_v5, %v52_v61 }
  0x10   :  { %v89_v4 = vmax.f32 %v73_v60, 0.0  ;;  %v238_v7 = vpack.c.bf16 %v87_v63, %v86_v62 }
  0x11   :  { %v90_v8 = vmax.f32 %v74_v0, 0.0  ;;  %253 = vst [vmem:[%s394_s3 + $0x20] sm:$0xff] %v233_v1   ;;  %v91_v10 = vmax.f32 %v75_v6, 0.0 }
  0x12   :  { %v243_v9 = vpack.c.bf16 %v89_v4, %v88_v3  ;;  %254 = vst [vmem:[%s394_s3 + $0x28] sm:$0xff] %v238_v7  }
  0x13   :  { %v248_v2 = vpack.c.bf16 %v91_v10, %v90_v8 }
  0x14   :  { %255 = vst [vmem:[%s394_s3 + $0x30] sm:$0xff] %v243_v9  }
  0x15   :  { %256 = vst [vmem:[%s394_s3 + $0x38] sm:$0xff] %v248_v2  }

// kernel: basic_block_forward.8
= control target key start
LH: loop header
LB: loop body
LE: loop exit
PB: predicated region body
PF: predicated region fallthrough
CT: control target
= control target key end

     0   :  { %vm132_vm0 = vcmask 1043456   ;;  %vm107_vm1 = vcmask 588800   ;;  %v417_v14 = vmov 0.0   ;;  %s556_s1 = inlined_call_operand.vmem [shape: bf16[72,128], index: 1, kind: input, shape index: {}]   ;;  %s557_s0 = inlined_call_operand.vmem [shape: bf16[128,72], index: 0, kind: input, shape index: {}]   ;;  %s558_s3 = inlined_call_operand.vmem [shape: f32[1,128], index: 3, kind: output, shape index: {1}]   ;;  %s559_s4 = inlined_call_operand.vmem [shape: f32[1,128], index: 4, kind: output, shape index: {2}]   ;;  %s560_s2 = inlined_call_operand.vmem [shape: f32[128,128], index: 2, kind: output, shape index: {0}]  }
   0x1   :  { %v404_v0 = vld [vmem:[%s556_s1 + $0x20] ss:$0 sps:$4 sm:$0xff]   ;;  %v405_v1 = vld [vmem:[%s556_s1 + $0x18] sm:$0xff]   ;;  %v406_v3 = vld [vmem:[%s556_s1 + $0x10] sm:$0xff]   ;;  %253 = vst [vmem:[%s558_s3] sm:$0x1] %v417_v14 }
   0x2   :  { %401 = vmatprep.subr.msk.bf16.mxu0 %vm132_vm0, %v404_v0  ;;  %v134_v2 = vsel %vm132_vm0, %v404_v0, 0  ;;  %402 = vmatprep.subr.msk.bf16.mxu1 %vm132_vm0, %v404_v0  ;;  %v409_v4 = vld [vmem:[%s557_s0] sm:$0xff]   ;;  %v407_v5 = vld [vmem:[%s556_s1 + $0x8] sm:$0xff]   ;;  %v411_v10 = vld [vmem:[%s557_s0 + $0x10] sm:$0xff]   ;;  %254 = vst [vmem:[%s559_s4] sm:$0x1] %v417_v14 }
   0x3   :  { %366 = vmatpush3.bf16.msra.mxu0 %v134_v2  ;;  %396 = vmatpush3.bf16.msra.mxu1 %v134_v2  ;;  %v413_v6 = vld [vmem:[%s557_s0 + $0x20] sm:$0xff]   ;;  %v410_v8 = vld [vmem:[%s557_s0 + $0x8] sm:$0xff]   ;;  %v415_v11 = vld [vmem:[%s557_s0 + $0x30] sm:$0xff]  }
   0x4   :  { %367 = vmatprep.subr.bf16.mxu0 %v405_v1  ;;  %392 = vmatprep.subr.bf16.mxu1 %v405_v1  ;;  %v408_v7 = vld [vmem:[%s556_s1] sm:$0xff]   ;;  %v414_v9 = vld [vmem:[%s557_s0 + $0x28] sm:$0xff]   ;;  %v412_v12 = vld [vmem:[%s557_s0 + $0x18] sm:$0xff]  }
   0x5   :  { %375 = vmatprep.mubr.msk.bf16.mxu0 %vm107_vm1, %v409_v4  ;;  %383 = vmatprep.mubr.msk.bf16.mxu1 %vm107_vm1, %v413_v6  ;;  %v416_v13 = vld [vmem:[%s557_s0 + $0x38] sm:$0xff]  }
   0x7   :  { %368 = vmatpush3.bf16.msra.mxu0 %v405_v1  ;;  %397 = vmatpush3.bf16.msra.mxu1 %v405_v1 }
   0x8   :  { %369 = vmatprep.subr.bf16.mxu0 %v406_v3  ;;  %393 = vmatprep.subr.bf16.mxu1 %v406_v3 }
   0xb   :  { %370 = vmatpush3.bf16.msra.mxu0 %v406_v3  ;;  %398 = vmatpush3.bf16.msra.mxu1 %v406_v3 }
   0xc   :  { %371 = vmatprep.subr.bf16.mxu0 %v407_v5  ;;  %394 = vmatprep.subr.bf16.mxu1 %v407_v5 }
   0xf   :  { %372 = vmatpush3.bf16.msra.mxu0 %v407_v5  ;;  %399 = vmatpush3.bf16.msra.mxu1 %v407_v5 }
  0x10   :  { %373 = vmatprep.subr.bf16.mxu0 %v408_v7  ;;  %395 = vmatprep.subr.bf16.mxu1 %v408_v7 }
  0x13   :  { %374 = vmatpush3.bf16.msra.mxu0 %v408_v7  ;;  %400 = vmatpush3.bf16.msra.mxu1 %v408_v7 }
  0x16   :  { %376 = vmatmul.mubr.msk.bf16.vlgmr.msra.gmra.mxu0 %vm107_vm1, %v410_v8  ;;  %384 = vmatmul.mubr.msk.bf16.vlgmr.msra.gmra.mxu1 %vm107_vm1, %v414_v9 }
  0x17   :  { %379 = vmatprep.mubr.msk.bf16.mxu0 %vm107_vm1, %v411_v10  ;;  %387 = vmatprep.mubr.msk.bf16.mxu1 %vm107_vm1, %v415_v11 }
  0x1e   :  { %380 = vmatmul.mubr.msk.bf16.gmra.mxu0 %vm107_vm1, %v412_v12  ;;  %388 = vmatmul.mubr.msk.bf16.gmra.mxu1 %vm107_vm1, %v416_v13 }
  0xd6   :  { %v377_v15 = vpop.f32.mrf.mxu0  ;;  %v385_v16 = vpop.f32.mrf.mxu1 }
  0xd7   :  { %235 = vst [vmem:[%s560_s2 + $0x10] sm:$0xff] %v377_v15  ;;  %243 = vst [vmem:[%s560_s2 + $0x50] sm:$0xff] %v385_v16  ;;  %v282_v28 = vmul.f32 %v377_v15, %v377_v15  ;;  %v290_v58 = vmul.f32 %v385_v16, %v385_v16 }
  0xd8   :  { %v170_v17 = vpop.f32.mrf.mxu0  ;;  %v202_v18 = vpop.f32.mrf.mxu1 }
  0xd9   :  { %233 = vst [vmem:[%s560_s2] sm:$0xff] %v170_v17  ;;  %241 = vst [vmem:[%s560_s2 + $0x40] sm:$0xff] %v202_v18  ;;  %v280_v23 = vmul.f32 %v170_v17, %v170_v17  ;;  %v288_v52 = vmul.f32 %v202_v18, %v202_v18 }
  0xda   :  { %v378_v19 = vpop.f32.mrf.mxu0  ;;  %v386_v20 = vpop.f32.mrf.mxu1 }
  0xdb   :  { %236 = vst [vmem:[%s560_s2 + $0x18] sm:$0xff] %v378_v19  ;;  %244 = vst [vmem:[%s560_s2 + $0x58] sm:$0xff] %v386_v20  ;;  %v283_v33 = vmul.f32 %v378_v19, %v378_v19  ;;  %v291_v61 = vmul.f32 %v386_v20, %v386_v20 }
  0xdc   :  { %v173_v21 = vpop.f32.mrf.mxu0  ;;  %v205_v22 = vpop.f32.mrf.mxu1 }
  0xdd   :  { %234 = vst [vmem:[%s560_s2 + $0x8] sm:$0xff] %v173_v21  ;;  %v256_v24 = vadd.f32 %v173_v21, %v170_v17  ;;  %v281_v25 = vmul.f32 %v173_v21, %v173_v21  ;;  %242 = vst [vmem:[%s560_s2 + $0x48] sm:$0xff] %v205_v22  ;;  %v289_v56 = vmul.f32 %v205_v22, %v205_v22 }
  0xde   :  { %v381_v26 = vpop.f32.mrf.mxu0  ;;  %v389_v27 = vpop.f32.mrf.mxu1 }
  0xdf   :  { %v257_v29 = vadd.f32 %v377_v15, %v256_v24  ;;  %v296_v30 = vadd.f32 %v281_v25, %v280_v23  ;;  %239 = vst [vmem:[%s560_s2 + $0x30] sm:$0xff] %v381_v26  ;;  %247 = vst [vmem:[%s560_s2 + $0x70] sm:$0xff] %v389_v27  ;;  %v286_v46 = vmul.f32 %v381_v26, %v381_v26  ;;  %v279_v25 = vld [vmem:[%s559_s4] sm:$0x1] }
  0xe0   :  { %v186_v31 = vpop.f32.mrf.mxu0  ;;  %v218_v32 = vpop.f32.mrf.mxu1  ;;  %v294_v6 = vmul.f32 %v389_v27, %v389_v27 }
  0xe1   :  { %v297_v34 = vadd.f32 %v296_v30, %v282_v28  ;;  %237 = vst [vmem:[%s560_s2 + $0x20] sm:$0xff] %v186_v31  ;;  %v258_v35 = vadd.f32 %v378_v19, %v257_v29  ;;  %245 = vst [vmem:[%s560_s2 + $0x60] sm:$0xff] %v218_v32  ;;  %v284_v39 = vmul.f32 %v186_v31, %v186_v31 }
  0xe2   :  { %v382_v36 = vpop.f32.mrf.mxu0  ;;  %v390_v37 = vpop.f32.mrf.mxu1  ;;  %v292_v1 = vmul.f32 %v218_v32, %v218_v32 }
  0xe3   :  { %v259_v38 = vadd.f32 %v258_v35, %v186_v31  ;;  %v298_v40 = vadd.f32 %v297_v34, %v283_v33  ;;  %240 = vst [vmem:[%s560_s2 + $0x38] sm:$0xff] %v382_v36  ;;  %248 = vst [vmem:[%s560_s2 + $0x78] sm:$0xff] %v390_v37  ;;  %v287_v49 = vmul.f32 %v382_v36, %v382_v36 }
  0xe4   :  { %v189_v41 = vpop.f32.mrf.mxu0  ;;  %v221_v42 = vpop.f32.mrf.mxu1  ;;  %v295_v9 = vmul.f32 %v390_v37, %v390_v37 }
  0xe5   :  { %v299_v43 = vadd.f32 %v298_v40, %v284_v39  ;;  %238 = vst [vmem:[%s560_s2 + $0x28] sm:$0xff] %v189_v41  ;;  %v260_v44 = vadd.f32 %v259_v38, %v189_v41  ;;  %v285_v45 = vmul.f32 %v189_v41, %v189_v41  ;;  %246 = vst [vmem:[%s560_s2 + $0x68] sm:$0xff] %v221_v42 }
  0xe6   :  { %v293_v5 = vmul.f32 %v221_v42, %v221_v42 }
  0xe7   :  { %v261_v47 = vadd.f32 %v381_v26, %v260_v44  ;;  %v300_v48 = vadd.f32 %v299_v43, %v285_v45 }
  0xe9   :  { %v262_v50 = vadd.f32 %v382_v36, %v261_v47  ;;  %v301_v51 = vadd.f32 %v300_v48, %v286_v46 }
  0xeb   :  { %v302_v53 = vadd.f32 %v301_v51, %v287_v49  ;;  %v263_v54 = vadd.f32 %v262_v50, %v202_v18 }
  0xed   :  { %v264_v55 = vadd.f32 %v263_v54, %v205_v22  ;;  %v303_v57 = vadd.f32 %v302_v53, %v288_v52  ;;  %v255_v22 = vld [vmem:[%s558_s3] sm:$0x1] }
  0xef   :  { %v265_v59 = vadd.f32 %v385_v16, %v264_v55  ;;  %v304_v60 = vadd.f32 %v303_v57, %v289_v56 }
  0xf1   :  { %v305_v62 = vadd.f32 %v304_v60, %v290_v58  ;;  %v266_v63 = vadd.f32 %v386_v20, %v265_v59 }
  0xf3   :  { %v267_v0 = vadd.f32 %v266_v63, %v218_v32  ;;  %v306_v2 = vadd.f32 %v305_v62, %v291_v61 }
  0xf5   :  { %v307_v3 = vadd.f32 %v306_v2, %v292_v1  ;;  %v268_v4 = vadd.f32 %v267_v0, %v221_v42 }
  0xf7   :  { %v269_v7 = vadd.f32 %v389_v27, %v268_v4  ;;  %v308_v8 = vadd.f32 %v307_v3, %v293_v5 }
  0xf9   :  { %v270_v10 = vadd.f32 %v390_v37, %v269_v7  ;;  %v309_v11 = vadd.f32 %v308_v8, %v294_v6 }
  0xfb   :  { %v271_v12 = vrot.slane %v270_v10, 4  ;;  %v310_v13 = vadd.f32 %v309_v11, %v295_v9 }
  0xfd   :  { %v272_v14 = vadd.f32 %v271_v12, %v270_v10  ;;  %v311_v15 = vrot.slane %v310_v13, 4 }
  0xff   :  { %v273_v16 = vrot.slane %v272_v14, 2  ;;  %v312_v17 = vadd.f32 %v311_v15, %v310_v13 }
 0x101   :  { %v274_v18 = vadd.f32 %v273_v16, %v272_v14  ;;  %v313_v19 = vrot.slane %v312_v17, 2 }
 0x103   :  { %v275_v20 = vrot.slane %v274_v18, 1  ;;  %v314_v21 = vadd.f32 %v313_v19, %v312_v17 }
 0x105   :  { %v276_v23 = vadd.f32 %v275_v20, %v274_v18  ;;  %v315_v24 = vrot.slane %v314_v21, 1 }
 0x107   :  { %v277_v26 = vadd.f32 %v276_v23, %v255_v22  ;;  %v316_v27 = vadd.f32 %v315_v24, %v314_v21 }
 0x109   :  { %278 = vst [vmem:[%s558_s3] sm:$0x1] %v277_v26  ;;  %v317_v28 = vadd.f32 %v316_v27, %v279_v25 }
 0x10b   :  { %318 = vst [vmem:[%s559_s4] sm:$0x1] %v317_v28 }

// kernel: basic_block_forward.9
= control target key start
LH: loop header
LB: loop body
LE: loop exit
PB: predicated region body
PF: predicated region fallthrough
CT: control target
= control target key end

     0   :  { %s466_s0 = inlined_call_operand.vmem [shape: f32[128,128], index: 0, kind: input, shape index: {}]   ;;  %s467_s1 = inlined_call_operand.vmem [shape: f32[1,128], index: 1, kind: input, shape index: {}]   ;;  %s468_s2 = inlined_call_operand.vmem [shape: f32[1,128], index: 2, kind: input, shape index: {}]   ;;  %s469_s3 = inlined_call_operand.vmem [shape: f32[128,128], index: 3, kind: input, shape index: {}]   ;;  %s470_s4 = inlined_call_operand.vmem [shape: f32[1,128], index: 4, kind: input, shape index: {}]   ;;  %s471_s5 = inlined_call_operand.vmem [shape: f32[1,128], index: 5, kind: input, shape index: {}]   ;;  %s472_s6 = inlined_call_operand.vmem [shape: f32[128,128], index: 6, kind: output, shape index: {}]  }
   0x1   :  { %v23_v0 = vld [vmem:[%s466_s0] sm:$0xff]  ;;  %v24_v8 = vld [vmem:[%s466_s0 + $0x8] sm:$0xff]  ;;  %v25_v10 = vld [vmem:[%s466_s0 + $0x10] sm:$0xff] }
   0x2   :  { %v244_v1 = vld [vmem:[%s467_s1] ss:$0 sm:$0xff]  ;;  %v86_v9 = vld [vmem:[%s469_s3 + $0x8] sm:$0xff]  ;;  %v87_v15 = vld [vmem:[%s469_s3 + $0x10] sm:$0xff] }
   0x3   :  { %v249_v2 = vld [vmem:[%s468_s2] ss:$0 sm:$0xff]  ;;  %v46_v3 = vmul.f32 %v244_v1, %v23_v0  ;;  %v47_v12 = vmul.f32 %v244_v1, %v24_v8  ;;  %v48_v14 = vmul.f32 %v244_v1, %v25_v10  ;;  %v26_v16 = vld [vmem:[%s466_s0 + $0x18] sm:$0xff]  ;;  %v28_v24 = vld [vmem:[%s466_s0 + $0x28] sm:$0xff] }
   0x4   :  { %v85_v4 = vld [vmem:[%s469_s3] sm:$0xff]  ;;  %v88_v17 = vld [vmem:[%s469_s3 + $0x18] sm:$0xff]  ;;  %v49_v20 = vmul.f32 %v244_v1, %v26_v16  ;;  %v90_v29 = vld [vmem:[%s469_s3 + $0x28] sm:$0xff]  ;;  %v51_v38 = vmul.f32 %v244_v1, %v28_v24 }
   0x5   :  { %v258_v5 = vld [vmem:[%s470_s4] ss:$0 sm:$0xff]  ;;  %v69_v11 = vadd.f32 %v249_v2, %v46_v3  ;;  %v70_v25 = vadd.f32 %v249_v2, %v47_v12  ;;  %v71_v27 = vadd.f32 %v249_v2, %v48_v14  ;;  %v29_v34 = vld [vmem:[%s466_s0 + $0x30] sm:$0xff]  ;;  %v30_v44 = vld [vmem:[%s466_s0 + $0x38] sm:$0xff] }
   0x6   :  { %v263_v6 = vld [vmem:[%s471_s5] ss:$0 sm:$0xff]  ;;  %v108_v7 = vmul.f32 %v258_v5, %v85_v4  ;;  %v109_v13 = vmul.f32 %v258_v5, %v86_v9  ;;  %v110_v19 = vmul.f32 %v258_v5, %v87_v15  ;;  %v111_v21 = vmul.f32 %v258_v5, %v88_v17  ;;  %v91_v39 = vld [vmem:[%s469_s3 + $0x30] sm:$0xff]  ;;  %v92_v45 = vld [vmem:[%s469_s3 + $0x38] sm:$0xff] }
   0x7   :  { %v27_v22 = vld [vmem:[%s466_s0 + $0x20] sm:$0xff]  ;;  %v72_v32 = vadd.f32 %v249_v2, %v49_v20  ;;  %v113_v43 = vmul.f32 %v258_v5, %v90_v29  ;;  %v74_v48 = vadd.f32 %v249_v2, %v51_v38  ;;  %v52_v49 = vmul.f32 %v244_v1, %v29_v34  ;;  %v32_v56 = vld [vmem:[%s466_s0 + $0x48] sm:$0xff]  ;;  %v33_v4 = vld [vmem:[%s466_s0 + $0x50] sm:$0xff] }
   0x8   :  { %v131_v18 = vadd.f32 %v263_v6, %v108_v7  ;;  %v89_v23 = vld [vmem:[%s469_s3 + $0x20] sm:$0xff]  ;;  %v132_v26 = vadd.f32 %v263_v6, %v109_v13  ;;  %v50_v28 = vmul.f32 %v244_v1, %v27_v22  ;;  %v133_v31 = vadd.f32 %v263_v6, %v110_v19  ;;  %v94_v3 = vld [vmem:[%s469_s3 + $0x48] sm:$0xff]  ;;  %v34_v12 = vld [vmem:[%s466_s0 + $0x58] sm:$0xff] }
   0x9   :  { %v134_v33 = vadd.f32 %v263_v6, %v111_v21  ;;  %v112_v37 = vmul.f32 %v258_v5, %v89_v23  ;;  %v31_v50 = vld [vmem:[%s466_s0 + $0x40] sm:$0xff]  ;;  %v136_v54 = vadd.f32 %v263_v6, %v113_v43  ;;  %v114_v55 = vmul.f32 %v258_v5, %v91_v39  ;;  %v96_v17 = vld [vmem:[%s469_s3 + $0x58] sm:$0xff]  ;;  %v37_v34 = vld [vmem:[%s466_s0 + $0x70] sm:$0xff] }
   0xa   :  { %v147_v30 = vadd.f32 %v131_v18, %v69_v11  ;;  %v148_v35 = vadd.f32 %v132_v26, %v70_v25  ;;  %v73_v36 = vadd.f32 %v249_v2, %v50_v28  ;;  %v149_v41 = vadd.f32 %v133_v31, %v71_v27  ;;  %v93_v51 = vld [vmem:[%s469_s3 + $0x40] sm:$0xff]  ;;  %v95_v11 = vld [vmem:[%s469_s3 + $0x50] sm:$0xff]  ;;  %v36_v28 = vld [vmem:[%s466_s0 + $0x68] sm:$0xff] }
   0xb   :  { %v150_v42 = vadd.f32 %v134_v33, %v72_v32  ;;  %v135_v47 = vadd.f32 %v263_v6, %v112_v37  ;;  %v75_v58 = vadd.f32 %v249_v2, %v52_v49  ;;  %v53_v59 = vmul.f32 %v244_v1, %v30_v44  ;;  %v35_v22 = vld [vmem:[%s466_s0 + $0x60] sm:$0xff]  ;;  %v98_v33 = vld [vmem:[%s469_s3 + $0x68] sm:$0xff]  ;;  %v99_v43 = vld [vmem:[%s469_s3 + $0x70] sm:$0xff] }
   0xc   :  { %v163_v40 = vmax.f32 %v147_v30, 0.0  ;;  %v164_v46 = vmax.f32 %v148_v35, 0.0  ;;  %v165_v52 = vmax.f32 %v149_v41, 0.0  ;;  %v115_v60 = vmul.f32 %v258_v5, %v92_v45  ;;  %v97_v27 = vld [vmem:[%s469_s3 + $0x60] sm:$0xff]  ;;  %v100_v49 = vld [vmem:[%s469_s3 + $0x78] sm:$0xff] }
   0xd   :  { %v166_v53 = vmax.f32 %v150_v42, 0.0  ;;  %v151_v57 = vadd.f32 %v135_v47, %v73_v36  ;;  %v152_v61 = vadd.f32 %v136_v54, %v74_v48  ;;  %v137_v62 = vadd.f32 %v263_v6, %v114_v55  ;;  %v38_v48 = vld [vmem:[%s466_s0 + $0x78] sm:$0xff] }
   0xe   :  { %179 = vst [vmem:[%s472_s6] sm:$0xff] %v163_v40  ;;  %180 = vst [vmem:[%s472_s6 + $0x8] sm:$0xff] %v164_v46  ;;  %v54_v63 = vmul.f32 %v244_v1, %v31_v50  ;;  %v116_v0 = vmul.f32 %v258_v5, %v93_v51  ;;  %v76_v8 = vadd.f32 %v249_v2, %v53_v59 }
   0xf   :  { %181 = vst [vmem:[%s472_s6 + $0x10] sm:$0xff] %v165_v52  ;;  %182 = vst [vmem:[%s472_s6 + $0x18] sm:$0xff] %v166_v53  ;;  %v167_v7 = vmax.f32 %v151_v57, 0.0  ;;  %v138_v9 = vadd.f32 %v263_v6, %v115_v60  ;;  %v55_v10 = vmul.f32 %v244_v1, %v32_v56  ;;  %v168_v13 = vmax.f32 %v152_v61, 0.0 }
  0x10   :  { %v153_v14 = vadd.f32 %v137_v62, %v75_v58  ;;  %v77_v15 = vadd.f32 %v249_v2, %v54_v63  ;;  %v139_v16 = vadd.f32 %v263_v6, %v116_v0  ;;  %v117_v20 = vmul.f32 %v258_v5, %v94_v3 }
  0x11   :  { %183 = vst [vmem:[%s472_s6 + $0x20] sm:$0xff] %v167_v7  ;;  %v154_v18 = vadd.f32 %v138_v9, %v76_v8  ;;  %v78_v19 = vadd.f32 %v249_v2, %v55_v10  ;;  %v56_v21 = vmul.f32 %v244_v1, %v33_v4  ;;  %184 = vst [vmem:[%s472_s6 + $0x28] sm:$0xff] %v168_v13 }
  0x12   :  { %v169_v23 = vmax.f32 %v153_v14, 0.0  ;;  %v155_v24 = vadd.f32 %v139_v16, %v77_v15  ;;  %v118_v25 = vmul.f32 %v258_v5, %v95_v11  ;;  %v57_v26 = vmul.f32 %v244_v1, %v34_v12 }
  0x13   :  { %v170_v29 = vmax.f32 %v154_v18, 0.0  ;;  %v140_v30 = vadd.f32 %v263_v6, %v117_v20  ;;  %v79_v31 = vadd.f32 %v249_v2, %v56_v21  ;;  %v119_v32 = vmul.f32 %v258_v5, %v96_v17 }
  0x14   :  { %185 = vst [vmem:[%s472_s6 + $0x30] sm:$0xff] %v169_v23  ;;  %v171_v35 = vmax.f32 %v155_v24, 0.0  ;;  %v141_v36 = vadd.f32 %v263_v6, %v118_v25  ;;  %v80_v37 = vadd.f32 %v249_v2, %v57_v26  ;;  %v58_v38 = vmul.f32 %v244_v1, %v35_v22 }
  0x15   :  { %186 = vst [vmem:[%s472_s6 + $0x38] sm:$0xff] %v170_v29  ;;  %v156_v39 = vadd.f32 %v140_v30, %v78_v19  ;;  %v142_v40 = vadd.f32 %v263_v6, %v119_v32  ;;  %v120_v41 = vmul.f32 %v258_v5, %v97_v27  ;;  %v59_v42 = vmul.f32 %v244_v1, %v36_v28 }
  0x16   :  { %187 = vst [vmem:[%s472_s6 + $0x40] sm:$0xff] %v171_v35  ;;  %v157_v44 = vadd.f32 %v141_v36, %v79_v31  ;;  %v81_v45 = vadd.f32 %v249_v2, %v58_v38  ;;  %v121_v46 = vmul.f32 %v258_v5, %v98_v33  ;;  %v60_v47 = vmul.f32 %v244_v1, %v37_v34 }
  0x17   :  { %v172_v50 = vmax.f32 %v156_v39, 0.0  ;;  %v158_v51 = vadd.f32 %v142_v40, %v80_v37  ;;  %v143_v52 = vadd.f32 %v263_v6, %v120_v41  ;;  %v82_v53 = vadd.f32 %v249_v2, %v59_v42 }
  0x18   :  { %v173_v54 = vmax.f32 %v157_v44, 0.0  ;;  %v144_v55 = vadd.f32 %v263_v6, %v121_v46  ;;  %v83_v56 = vadd.f32 %v249_v2, %v60_v47  ;;  %v122_v57 = vmul.f32 %v258_v5, %v99_v43 }
  0x19   :  { %188 = vst [vmem:[%s472_s6 + $0x48] sm:$0xff] %v172_v50  ;;  %v174_v58 = vmax.f32 %v158_v51, 0.0  ;;  %v159_v59 = vadd.f32 %v143_v52, %v81_v45  ;;  %v61_v60 = vmul.f32 %v244_v1, %v38_v48  ;;  %v123_v61 = vmul.f32 %v258_v5, %v100_v49 }
  0x1a   :  { %189 = vst [vmem:[%s472_s6 + $0x50] sm:$0xff] %v173_v54  ;;  %v160_v62 = vadd.f32 %v144_v55, %v82_v53  ;;  %v145_v63 = vadd.f32 %v263_v6, %v122_v57 }
  0x1b   :  { %190 = vst [vmem:[%s472_s6 + $0x58] sm:$0xff] %v174_v58  ;;  %v175_v0 = vmax.f32 %v159_v59, 0.0  ;;  %v84_v3 = vadd.f32 %v249_v2, %v61_v60  ;;  %v146_v4 = vadd.f32 %v263_v6, %v123_v61 }
  0x1c   :  { %v176_v7 = vmax.f32 %v160_v62, 0.0  ;;  %v161_v1 = vadd.f32 %v145_v63, %v83_v56 }
  0x1d   :  { %191 = vst [vmem:[%s472_s6 + $0x60] sm:$0xff] %v175_v0  ;;  %v162_v5 = vadd.f32 %v146_v4, %v84_v3 }
  0x1e   :  { %192 = vst [vmem:[%s472_s6 + $0x68] sm:$0xff] %v176_v7  ;;  %v177_v8 = vmax.f32 %v161_v1, 0.0 }
  0x1f   :  { %v178_v9 = vmax.f32 %v162_v5, 0.0 }
  0x20   :  { %193 = vst [vmem:[%s472_s6 + $0x70] sm:$0xff] %v177_v8 }
  0x21   :  { %194 = vst [vmem:[%s472_s6 + $0x78] sm:$0xff] %v178_v9 }

</bundles_post_ra>
